<compile_context>
chip_gen: v7x
topology: tpu7x:2x2x1
jax: 0.10.0
libtpu: 0.0.40
codegen_flags: <defaults>
</compile_context>

<pallas_src>
import functools
import math

import jax
import jax.numpy as jnp
from jax.experimental import pallas as pl
from jax.experimental.pallas import tpu as pltpu


# ----------------------------- helpers -----------------------------

def _row_tile(n):
    """Pick a row tile: full array for small N, else the largest divisor tile."""
    if n <= 512:
        return n
    for t in (512, 256, 128, 64, 32, 16, 8):
        if n % t == 0:
            return t
    return n


def _parallel_params():
    return pltpu.CompilerParams(dimension_semantics=("parallel",))


# ----------------------------- fused attention block -----------------------------

def _attn_block_kernel(xq_ref, xkv_ref, mask_ref,
                       wq_ref, bq_ref, wkv_ref, bkv_ref,
                       wo_ref, bo_ref, g_ref, bb_ref,
                       o_ref, *, num_heads, scale, eps):
    # xq:  (1, Sq, D) bf16  -- query / residual input
    # xkv: (1, Sk, D) bf16  -- key/value source (x for self-attn, enc for cross)
    # mask:(1, Sq, Sk) f32  -- 1 = attend, 0 = masked
    d = xq_ref.shape[-1]
    hd = d // num_heads

    xq = xq_ref[0]                       # (Sq, D) bf16
    xkv = xkv_ref[0]                     # (Sk, D) bf16
    m = mask_ref[0]                      # (Sq, Sk) f32

    # Q and concatenated K|V projections, f32 accumulation on the MXU.
    q = jnp.dot(xq, wq_ref[...], preferred_element_type=jnp.float32) + bq_ref[...]
    kv = jnp.dot(xkv, wkv_ref[...], preferred_element_type=jnp.float32) + bkv_ref[...]
    # fold the softmax scale into Q before the QK^T dot
    q = (q * scale).astype(jnp.bfloat16)       # (Sq, D)
    kv = kv.astype(jnp.bfloat16)               # (Sk, 2D)  = K | V

    neg = jnp.float32(-1e30)
    outs = []
    for h in range(num_heads):                 # static unroll over heads
        q_h = q[:, h * hd:(h + 1) * hd]                    # (Sq, hd)
        k_h = kv[:, h * hd:(h + 1) * hd]                   # (Sk, hd)
        v_h = kv[:, d + h * hd:d + (h + 1) * hd]           # (Sk, hd)
        # contract on hd for both operands -> no explicit K transpose
        s = jax.lax.dot_general(q_h, k_h, (((1,), (1,)), ((), ())),
                                preferred_element_type=jnp.float32)   # (Sq, Sk)
        s = jnp.where(m > 0.0, s, neg)         # masked_fill(mask==0, -inf)
        s = s - jnp.max(s, axis=-1, keepdims=True)
        p = jnp.exp(s)
        p = p * pl.reciprocal(jnp.sum(p, axis=-1, keepdims=True), approx=True)
        o_h = jnp.dot(p.astype(jnp.bfloat16), v_h,
                      preferred_element_type=jnp.float32)             # (Sq, hd)
        outs.append(o_h)
    ctx = jnp.concatenate(outs, axis=-1).astype(jnp.bfloat16)         # (Sq, D)

    # output projection + residual + LayerNorm, one lane-dense (Sq, D) store.
    proj = jnp.dot(ctx, wo_ref[...], preferred_element_type=jnp.float32) + bo_ref[...]
    z = proj + xq.astype(jnp.float32)
    mu = jnp.mean(z, axis=-1, keepdims=True)
    var = jnp.mean((z - mu) ** 2, axis=-1, keepdims=True)
    zn = (z - mu) * jax.lax.rsqrt(var + eps)
    o_ref[0] = (zn * g_ref[...] + bb_ref[...]).astype(o_ref.dtype)


def pallas_attn_block(xq, xkv, mask, p, gamma, beta, *, num_heads, eps,
                      out_dtype=jnp.bfloat16):
    # xq: (B, Sq, D), xkv: (B, Sk, D), mask: (B, Sq, Sk)
    B, Sq, D = xq.shape
    Sk = xkv.shape[1]
    scale = 1.0 / math.sqrt(D // num_heads)
    kernel = functools.partial(_attn_block_kernel,
                               num_heads=num_heads, scale=scale, eps=eps)
    return pl.pallas_call(
        kernel,
        out_shape=jax.ShapeDtypeStruct((B, Sq, D), out_dtype),
        grid=(B,),
        in_specs=[
            pl.BlockSpec((1, Sq, D), lambda b: (b, 0, 0)),       # xq (residual)
            pl.BlockSpec((1, Sk, D), lambda b: (b, 0, 0)),       # xkv
            pl.BlockSpec((1, Sq, Sk), lambda b: (b, 0, 0)),      # mask
            pl.BlockSpec((D, D), lambda b: (0, 0)),              # Wq (VMEM-resident)
            pl.BlockSpec((1, D), lambda b: (0, 0)),              # bq
            pl.BlockSpec((D, 2 * D), lambda b: (0, 0)),          # Wkv = [Wk | Wv]
            pl.BlockSpec((1, 2 * D), lambda b: (0, 0)),          # bkv
            pl.BlockSpec((D, D), lambda b: (0, 0)),              # Wo
            pl.BlockSpec((1, D), lambda b: (0, 0)),              # bo
            pl.BlockSpec((1, D), lambda b: (0, 0)),              # LN gamma
            pl.BlockSpec((1, D), lambda b: (0, 0)),              # LN beta
        ],
        out_specs=pl.BlockSpec((1, Sq, D), lambda b: (b, 0, 0)),
        compiler_params=_parallel_params(),
    )(xq, xkv, mask,
      p["wq"], p["bq"].reshape(1, D),
      p["wkv"], p["bkv"].reshape(1, 2 * D),
      p["wo"], p["bo"].reshape(1, D),
      gamma.reshape(1, D), beta.reshape(1, D))


# ----------------------------- fused FFN + residual + LN -----------------------------

def _ffn_res_ln_kernel(x_ref, w1_ref, b1_ref, w2_ref, b2_ref, g_ref, bb_ref,
                       o_ref, *, eps):
    # LayerNorm( x + FFN(x) ),  FFN = Linear -> ReLU -> Linear
    xb = x_ref[...]
    h = jnp.dot(xb, w1_ref[...], preferred_element_type=jnp.float32) + b1_ref[...]
    h = jnp.maximum(h, 0.0)
    y = jnp.dot(h.astype(jnp.bfloat16), w2_ref[...],
                preferred_element_type=jnp.float32) + b2_ref[...]
    z = xb.astype(jnp.float32) + y
    mu = jnp.mean(z, axis=-1, keepdims=True)
    var = jnp.mean((z - mu) ** 2, axis=-1, keepdims=True)
    zn = (z - mu) * jax.lax.rsqrt(var + eps)
    o_ref[...] = (zn * g_ref[...] + bb_ref[...]).astype(o_ref.dtype)


def pallas_ffn_residual_ln(x2d, w1, b1, w2, b2, gamma, beta, eps,
                           out_dtype=jnp.float32):
    n, d = x2d.shape
    dh = w1.shape[1]
    t = _row_tile(n)
    return pl.pallas_call(
        functools.partial(_ffn_res_ln_kernel, eps=eps),
        out_shape=jax.ShapeDtypeStruct((n, d), out_dtype),
        grid=(n // t,),
        in_specs=[
            pl.BlockSpec((t, d), lambda i: (i, 0)),              # x rows stream
            pl.BlockSpec((d, dh), lambda i: (0, 0)),             # W1 resident
            pl.BlockSpec((1, dh), lambda i: (0, 0)),
            pl.BlockSpec((dh, d), lambda i: (0, 0)),             # W2 resident
            pl.BlockSpec((1, d), lambda i: (0, 0)),
            pl.BlockSpec((1, d), lambda i: (0, 0)),
            pl.BlockSpec((1, d), lambda i: (0, 0)),
        ],
        out_specs=pl.BlockSpec((t, d), lambda i: (i, 0)),
        compiler_params=_parallel_params(),
    )(x2d, w1, b1.reshape(1, dh), w2, b2.reshape(1, d),
      gamma.reshape(1, d), beta.reshape(1, d))


# ----------------------------- model glue -----------------------------

def decoder_block_forward(params, x, encoder_output, mask, *, num_heads, eps):
    B, S, D = x.shape
    xb = x.astype(jnp.bfloat16)
    encb = encoder_output.astype(jnp.bfloat16)
    maskf = mask.astype(jnp.float32)

    # 1) fused self-attention block:  x1 = LN1( SelfAttn(x) + x )
    x1 = pallas_attn_block(xb, xb, maskf, params["attn1"],
                           params["ln1_g"], params["ln1_b"],
                           num_heads=num_heads, eps=eps)

    # 2) fused cross-attention block: x2 = LN2( CrossAttn(x1, enc) + x1 )
    #    (same mask reused, as in the reference forward)
    x2 = pallas_attn_block(x1, encb, maskf, params["attn2"],
                           params["ln2_g"], params["ln2_b"],
                           num_heads=num_heads, eps=eps)

    # 3) fused FFN block: out = LN3( x2 + FFN(x2) ), final output in f32
    out = pallas_ffn_residual_ln(
        x2.reshape(-1, D),
        params["ffn_w1"], params["ffn_b1"], params["ffn_w2"], params["ffn_b2"],
        params["ln3_g"], params["ln3_b"], eps,
        out_dtype=jnp.float32).reshape(B, S, D)
    return out


# ----------------------------- parameters -----------------------------

def _dense(key, din, dout):
    w = (jax.random.normal(key, (din, dout), jnp.float32) * 0.02).astype(jnp.bfloat16)
    b = jnp.zeros((dout,), jnp.float32)
    return w, b


def _init_attn(key, d):
    kq, kk, kv, ko = jax.random.split(key, 4)
    wq, bq = _dense(kq, d, d)
    wk, bk = _dense(kk, d, d)
    wv, bv = _dense(kv, d, d)
    wo, bo = _dense(ko, d, d)
    return {
        "wq": wq, "bq": bq,
        "wkv": jnp.concatenate([wk, wv], axis=1),   # (D, 2D), K | V
        "bkv": jnp.concatenate([bk, bv]),
        "wo": wo, "bo": bo,
    }


def init_block_params(key, d):
    k1, k2, k3, k4 = jax.random.split(key, 4)
    w1, b1 = _dense(k3, d, d)
    w2, b2 = _dense(k4, d, d)
    ones = jnp.ones((d,), jnp.float32)
    zeros = jnp.zeros((d,), jnp.float32)
    return {
        "attn1": _init_attn(k1, d),
        "attn2": _init_attn(k2, d),
        "ffn_w1": w1, "ffn_b1": b1, "ffn_w2": w2, "ffn_b2": b2,
        "ln1_g": ones, "ln1_b": zeros,
        "ln2_g": ones, "ln2_b": zeros,
        "ln3_g": ones, "ln3_b": zeros,
    }


# ----------------------------- main -----------------------------

if __name__ == "__main__":
    B, S, D, H = 2, 8, 32, 4
    EPS = 1e-5

    root = jax.random.PRNGKey(0)
    kp, kx, ke = jax.random.split(root, 3)

    params = init_block_params(kp, D)
    x = jax.random.normal(kx, (B, S, D), jnp.float32)
    encoder_output = jax.random.normal(ke, (B, S, D), jnp.float32)
    # causal mask: 1 = attend, 0 = masked
    mask = jnp.broadcast_to(jnp.tril(jnp.ones((S, S), jnp.float32)), (B, S, S))

    fwd = jax.jit(functools.partial(decoder_block_forward, num_heads=H, eps=EPS))
    out = jax.block_until_ready(fwd(params, x, encoder_output, mask))

    assert out.shape == (B, S, D)
    assert bool(jnp.all(jnp.isfinite(out)))
    print("KERNEL_OK")
</pallas_src>

<mosaic_0001>
module attributes {stable_mosaic.version = 11 : i64} {
  func.func @_ffn_res_ln_kernel(%arg0: i32, %arg1: memref<16x32xbf16, #tpu.memory_space<vmem>>, %arg2: memref<32x32xbf16, #tpu.memory_space<vmem>>, %arg3: memref<1x32xf32, #tpu.memory_space<vmem>>, %arg4: memref<32x32xbf16, #tpu.memory_space<vmem>>, %arg5: memref<1x32xf32, #tpu.memory_space<vmem>>, %arg6: memref<1x32xf32, #tpu.memory_space<vmem>>, %arg7: memref<1x32xf32, #tpu.memory_space<vmem>>, %arg8: memref<16x32xf32, #tpu.memory_space<vmem>>) attributes {dimension_semantics = [#tpu.dimension_semantics<parallel>], iteration_bounds = array<i64: 1>, scalar_prefetch = 0 : i64, scratch_operands = 0 : i64, tpu.core_type = #tpu.core_type<tc>, window_params = [{transform_indices = @transform_0, window_bounds = array<i64: 16, 32>}, {pipeline_mode = #tpu.pipeline_mode<synchronous>, transform_indices = @transform_1, window_bounds = array<i64: 32, 32>}, {pipeline_mode = #tpu.pipeline_mode<synchronous>, transform_indices = @transform_2, window_bounds = array<i64: 1, 32>}, {pipeline_mode = #tpu.pipeline_mode<synchronous>, transform_indices = @transform_3, window_bounds = array<i64: 32, 32>}, {pipeline_mode = #tpu.pipeline_mode<synchronous>, transform_indices = @transform_4, window_bounds = array<i64: 1, 32>}, {pipeline_mode = #tpu.pipeline_mode<synchronous>, transform_indices = @transform_5, window_bounds = array<i64: 1, 32>}, {pipeline_mode = #tpu.pipeline_mode<synchronous>, transform_indices = @transform_6, window_bounds = array<i64: 1, 32>}, {transform_indices = @transform_7, window_bounds = array<i64: 16, 32>}]} {
    %c0 = arith.constant 0 : index
    %c0_0 = arith.constant 0 : index
    %0 = vector.load %arg1[%c0, %c0_0] : memref<16x32xbf16, #tpu.memory_space<vmem>>, vector<16x32xbf16>
    %c0_1 = arith.constant 0 : index
    %c0_2 = arith.constant 0 : index
    %1 = vector.load %arg2[%c0_1, %c0_2] : memref<32x32xbf16, #tpu.memory_space<vmem>>, vector<32x32xbf16>
    %cst = arith.constant dense<0.000000e+00> : vector<16x32xf32>
    %2 = tpu.matmul %0, %1, %cst {dimension_numbers = #tpu.dot_dimension_numbers<[1], [0], [0], [1], [0, 0, 1, 1], [], []>} : vector<16x32xbf16>, vector<32x32xbf16>, vector<16x32xf32> -> vector<16x32xf32>
    %c0_3 = arith.constant 0 : index
    %c0_4 = arith.constant 0 : index
    %3 = vector.load %arg3[%c0_3, %c0_4] : memref<1x32xf32, #tpu.memory_space<vmem>>, vector<1x32xf32>
    %4 = vector.broadcast %3 : vector<1x32xf32> to vector<16x32xf32>
    %5 = arith.addf %2, %4 : vector<16x32xf32>
    %cst_5 = arith.constant 0.000000e+00 : f32
    %6 = vector.broadcast %cst_5 : f32 to vector<16x32xf32>
    %7 = arith.maximumf %5, %6 : vector<16x32xf32>
    %8 = arith.truncf %7 : vector<16x32xf32> to vector<16x32xbf16>
    %c0_6 = arith.constant 0 : index
    %c0_7 = arith.constant 0 : index
    %9 = vector.load %arg4[%c0_6, %c0_7] : memref<32x32xbf16, #tpu.memory_space<vmem>>, vector<32x32xbf16>
    %cst_8 = arith.constant dense<0.000000e+00> : vector<16x32xf32>
    %10 = tpu.matmul %8, %9, %cst_8 {dimension_numbers = #tpu.dot_dimension_numbers<[1], [0], [0], [1], [0, 0, 1, 1], [], []>} : vector<16x32xbf16>, vector<32x32xbf16>, vector<16x32xf32> -> vector<16x32xf32>
    %c0_9 = arith.constant 0 : index
    %c0_10 = arith.constant 0 : index
    %11 = vector.load %arg5[%c0_9, %c0_10] : memref<1x32xf32, #tpu.memory_space<vmem>>, vector<1x32xf32>
    %12 = vector.broadcast %11 : vector<1x32xf32> to vector<16x32xf32>
    %13 = arith.addf %10, %12 : vector<16x32xf32>
    %14 = arith.extf %0 : vector<16x32xbf16> to vector<16x32xf32>
    %15 = arith.addf %14, %13 : vector<16x32xf32>
    %cst_11 = arith.constant dense<0.000000e+00> : vector<16xf32>
    %16 = vector.multi_reduction <add>, %15, %cst_11 [1] : vector<16x32xf32> to vector<16xf32>
    %17 = vector.shape_cast %16 : vector<16xf32> to vector<16x1xf32>
    %cst_12 = arith.constant 3.200000e+01 : f32
    %18 = vector.broadcast %cst_12 : f32 to vector<16x1xf32>
    %19 = arith.divf %17, %18 : vector<16x1xf32>
    %20 = vector.broadcast %19 : vector<16x1xf32> to vector<16x32xf32>
    %21 = arith.subf %15, %20 : vector<16x32xf32>
    %22 = arith.mulf %21, %21 : vector<16x32xf32>
    %cst_13 = arith.constant dense<0.000000e+00> : vector<16xf32>
    %23 = vector.multi_reduction <add>, %22, %cst_13 [1] : vector<16x32xf32> to vector<16xf32>
    %24 = vector.shape_cast %23 : vector<16xf32> to vector<16x1xf32>
    %cst_14 = arith.constant 3.200000e+01 : f32
    %25 = vector.broadcast %cst_14 : f32 to vector<16x1xf32>
    %26 = arith.divf %24, %25 : vector<16x1xf32>
    %27 = vector.broadcast %19 : vector<16x1xf32> to vector<16x32xf32>
    %28 = arith.subf %15, %27 : vector<16x32xf32>
    %cst_15 = arith.constant 9.99999974E-6 : f32
    %29 = vector.broadcast %cst_15 : f32 to vector<16x1xf32>
    %30 = arith.addf %26, %29 : vector<16x1xf32>
    %31 = math.rsqrt %30 : vector<16x1xf32>
    %32 = vector.broadcast %31 : vector<16x1xf32> to vector<16x32xf32>
    %33 = arith.mulf %28, %32 : vector<16x32xf32>
    %c0_16 = arith.constant 0 : index
    %c0_17 = arith.constant 0 : index
    %34 = vector.load %arg6[%c0_16, %c0_17] : memref<1x32xf32, #tpu.memory_space<vmem>>, vector<1x32xf32>
    %35 = vector.broadcast %34 : vector<1x32xf32> to vector<16x32xf32>
    %36 = arith.mulf %33, %35 : vector<16x32xf32>
    %c0_18 = arith.constant 0 : index
    %c0_19 = arith.constant 0 : index
    %37 = vector.load %arg7[%c0_18, %c0_19] : memref<1x32xf32, #tpu.memory_space<vmem>>, vector<1x32xf32>
    %38 = vector.broadcast %37 : vector<1x32xf32> to vector<16x32xf32>
    %39 = arith.addf %36, %38 : vector<16x32xf32>
    %c0_20 = arith.constant 0 : index
    %c0_21 = arith.constant 0 : index
    %40 = vector.load %arg8[%c0_20, %c0_21] : memref<16x32xf32, #tpu.memory_space<vmem>>, vector<16x32xf32>
    tpu.vector_store %arg8[%c0_20, %c0_21], %39 {strides = array<i32>} : memref<16x32xf32, #tpu.memory_space<vmem>>, vector<16x32xf32>,
    return
  }
  func.func @transform_0(%arg0: i32) -> (i32, i32) {
    %c0_i32 = arith.constant 0 : i32
    %c0_i32_0 = arith.constant 0 : i32
    return %arg0, %c0_i32 : i32, i32
  }
  func.func @transform_1(%arg0: i32) -> (i32, i32) {
    %c0_i32 = arith.constant 0 : i32
    %c0_i32_0 = arith.constant 0 : i32
    %c0_i32_1 = arith.constant 0 : i32
    return %c0_i32, %c0_i32_0 : i32, i32
  }
  func.func @transform_2(%arg0: i32) -> (i32, i32) {
    %c0_i32 = arith.constant 0 : i32
    %c0_i32_0 = arith.constant 0 : i32
    %c0_i32_1 = arith.constant 0 : i32
    return %c0_i32, %c0_i32_0 : i32, i32
  }
  func.func @transform_3(%arg0: i32) -> (i32, i32) {
    %c0_i32 = arith.constant 0 : i32
    %c0_i32_0 = arith.constant 0 : i32
    %c0_i32_1 = arith.constant 0 : i32
    return %c0_i32, %c0_i32_0 : i32, i32
  }
  func.func @transform_4(%arg0: i32) -> (i32, i32) {
    %c0_i32 = arith.constant 0 : i32
    %c0_i32_0 = arith.constant 0 : i32
    %c0_i32_1 = arith.constant 0 : i32
    return %c0_i32, %c0_i32_0 : i32, i32
  }
  func.func @transform_5(%arg0: i32) -> (i32, i32) {
    %c0_i32 = arith.constant 0 : i32
    %c0_i32_0 = arith.constant 0 : i32
    %c0_i32_1 = arith.constant 0 : i32
    return %c0_i32, %c0_i32_0 : i32, i32
  }
  func.func @transform_6(%arg0: i32) -> (i32, i32) {
    %c0_i32 = arith.constant 0 : i32
    %c0_i32_0 = arith.constant 0 : i32
    %c0_i32_1 = arith.constant 0 : i32
    return %c0_i32, %c0_i32_0 : i32, i32
  }
  func.func @transform_7(%arg0: i32) -> (i32, i32) {
    %c0_i32 = arith.constant 0 : i32
    %c0_i32_0 = arith.constant 0 : i32
    return %arg0, %c0_i32 : i32, i32
  }
}

module attributes {stable_mosaic.version = 11 : i64} {
  func.func @_attn_block_kernel(%arg0: i32, %arg1: memref<1x8x32xbf16, #tpu.memory_space<vmem>>, %arg2: memref<1x8x32xbf16, #tpu.memory_space<vmem>>, %arg3: memref<1x8x8xf32, #tpu.memory_space<vmem>>, %arg4: memref<32x32xbf16, #tpu.memory_space<vmem>>, %arg5: memref<1x32xf32, #tpu.memory_space<vmem>>, %arg6: memref<32x64xbf16, #tpu.memory_space<vmem>>, %arg7: memref<1x64xf32, #tpu.memory_space<vmem>>, %arg8: memref<32x32xbf16, #tpu.memory_space<vmem>>, %arg9: memref<1x32xf32, #tpu.memory_space<vmem>>, %arg10: memref<1x32xf32, #tpu.memory_space<vmem>>, %arg11: memref<1x32xf32, #tpu.memory_space<vmem>>, %arg12: memref<1x8x32xbf16, #tpu.memory_space<vmem>>) attributes {dimension_semantics = [#tpu.dimension_semantics<parallel>], iteration_bounds = array<i64: 2>, scalar_prefetch = 0 : i64, scratch_operands = 0 : i64, tpu.core_type = #tpu.core_type<tc>, window_params = [{transform_indices = @transform_0, window_bounds = array<i64: 1, 8, 32>}, {transform_indices = @transform_1, window_bounds = array<i64: 1, 8, 32>}, {transform_indices = @transform_2, window_bounds = array<i64: 1, 8, 8>}, {pipeline_mode = #tpu.pipeline_mode<synchronous>, transform_indices = @transform_3, window_bounds = array<i64: 32, 32>}, {pipeline_mode = #tpu.pipeline_mode<synchronous>, transform_indices = @transform_4, window_bounds = array<i64: 1, 32>}, {pipeline_mode = #tpu.pipeline_mode<synchronous>, transform_indices = @transform_5, window_bounds = array<i64: 32, 64>}, {pipeline_mode = #tpu.pipeline_mode<synchronous>, transform_indices = @transform_6, window_bounds = array<i64: 1, 64>}, {pipeline_mode = #tpu.pipeline_mode<synchronous>, transform_indices = @transform_7, window_bounds = array<i64: 32, 32>}, {pipeline_mode = #tpu.pipeline_mode<synchronous>, transform_indices = @transform_8, window_bounds = array<i64: 1, 32>}, {pipeline_mode = #tpu.pipeline_mode<synchronous>, transform_indices = @transform_9, window_bounds = array<i64: 1, 32>}, {pipeline_mode = #tpu.pipeline_mode<synchronous>, transform_indices = @transform_10, window_bounds = array<i64: 1, 32>}, {transform_indices = @transform_11, window_bounds = array<i64: 1, 8, 32>}]} {
    %c0 = arith.constant 0 : index
    %c0_0 = arith.constant 0 : index
    %c0_1 = arith.constant 0 : index
    %0 = vector.load %arg1[%c0, %c0_0, %c0_1] : memref<1x8x32xbf16, #tpu.memory_space<vmem>>, vector<1x8x32xbf16>
    %1 = vector.shape_cast %0 : vector<1x8x32xbf16> to vector<8x32xbf16>
    %c0_2 = arith.constant 0 : index
    %c0_3 = arith.constant 0 : index
    %c0_4 = arith.constant 0 : index
    %2 = vector.load %arg2[%c0_2, %c0_3, %c0_4] : memref<1x8x32xbf16, #tpu.memory_space<vmem>>, vector<1x8x32xbf16>
    %3 = vector.shape_cast %2 : vector<1x8x32xbf16> to vector<8x32xbf16>
    %c0_5 = arith.constant 0 : index
    %c0_6 = arith.constant 0 : index
    %c0_7 = arith.constant 0 : index
    %4 = vector.load %arg3[%c0_5, %c0_6, %c0_7] : memref<1x8x8xf32, #tpu.memory_space<vmem>>, vector<1x8x8xf32>
    %5 = vector.shape_cast %4 : vector<1x8x8xf32> to vector<8x8xf32>
    %c0_8 = arith.constant 0 : index
    %c0_9 = arith.constant 0 : index
    %6 = vector.load %arg4[%c0_8, %c0_9] : memref<32x32xbf16, #tpu.memory_space<vmem>>, vector<32x32xbf16>
    %cst = arith.constant dense<0.000000e+00> : vector<8x32xf32>
    %7 = tpu.matmul %1, %6, %cst {dimension_numbers = #tpu.dot_dimension_numbers<[1], [0], [0], [1], [0, 0, 1, 1], [], []>} : vector<8x32xbf16>, vector<32x32xbf16>, vector<8x32xf32> -> vector<8x32xf32>
    %c0_10 = arith.constant 0 : index
    %c0_11 = arith.constant 0 : index
    %8 = vector.load %arg5[%c0_10, %c0_11] : memref<1x32xf32, #tpu.memory_space<vmem>>, vector<1x32xf32>
    %9 = vector.broadcast %8 : vector<1x32xf32> to vector<8x32xf32>
    %10 = arith.addf %7, %9 : vector<8x32xf32>
    %c0_12 = arith.constant 0 : index
    %c0_13 = arith.constant 0 : index
    %11 = vector.load %arg6[%c0_12, %c0_13] : memref<32x64xbf16, #tpu.memory_space<vmem>>, vector<32x64xbf16>
    %cst_14 = arith.constant dense<0.000000e+00> : vector<8x64xf32>
    %12 = tpu.matmul %3, %11, %cst_14 {dimension_numbers = #tpu.dot_dimension_numbers<[1], [0], [0], [1], [0, 0, 1, 1], [], []>} : vector<8x32xbf16>, vector<32x64xbf16>, vector<8x64xf32> -> vector<8x64xf32>
    %c0_15 = arith.constant 0 : index
    %c0_16 = arith.constant 0 : index
    %13 = vector.load %arg7[%c0_15, %c0_16] : memref<1x64xf32, #tpu.memory_space<vmem>>, vector<1x64xf32>
    %14 = vector.broadcast %13 : vector<1x64xf32> to vector<8x64xf32>
    %15 = arith.addf %12, %14 : vector<8x64xf32>
    %cst_17 = arith.constant 0.353553385 : f32
    %16 = vector.broadcast %cst_17 : f32 to vector<8x32xf32>
    %17 = arith.mulf %10, %16 : vector<8x32xf32>
    %18 = arith.truncf %17 : vector<8x32xf32> to vector<8x32xbf16>
    %19 = arith.truncf %15 : vector<8x64xf32> to vector<8x64xbf16>
    %20 = vector.extract_strided_slice %18 {offsets = [0, 0], sizes = [8, 8], strides = [1, 1]} : vector<8x32xbf16> to vector<8x8xbf16>
    %21 = vector.extract_strided_slice %19 {offsets = [0, 0], sizes = [8, 8], strides = [1, 1]} : vector<8x64xbf16> to vector<8x8xbf16>
    %22 = vector.extract_strided_slice %19 {offsets = [0, 32], sizes = [8, 8], strides = [1, 1]} : vector<8x64xbf16> to vector<8x8xbf16>
    %cst_18 = arith.constant dense<0.000000e+00> : vector<8x8xf32>
    %23 = tpu.matmul %20, %21, %cst_18 {dimension_numbers = #tpu.dot_dimension_numbers<[1], [1], [0], [0], [0, 0, 1, 0], [], []>} : vector<8x8xbf16>, vector<8x8xbf16>, vector<8x8xf32> -> vector<8x8xf32>
    %cst_19 = arith.constant 0.000000e+00 : f32
    %24 = vector.broadcast %cst_19 : f32 to vector<8x8xf32>
    %25 = arith.cmpf ogt, %5, %24 : vector<8x8xf32>
    %cst_20 = arith.constant -1.000000e+30 : f32
    %26 = vector.broadcast %cst_20 : f32 to vector<8x8xf32>
    %27 = arith.select %25, %23, %26 : vector<8x8xi1>, vector<8x8xf32>
    %cst_21 = arith.constant dense<0xFF800000> : vector<8xf32>
    %28 = vector.multi_reduction <maximumf>, %27, %cst_21 [1] : vector<8x8xf32> to vector<8xf32>
    %29 = vector.shape_cast %28 : vector<8xf32> to vector<8x1xf32>
    %30 = vector.broadcast %29 : vector<8x1xf32> to vector<8x8xf32>
    %31 = arith.subf %27, %30 : vector<8x8xf32>
    %32 = math.exp %31 : vector<8x8xf32>
    %cst_22 = arith.constant dense<0.000000e+00> : vector<8xf32>
    %33 = vector.multi_reduction <add>, %32, %cst_22 [1] : vector<8x8xf32> to vector<8xf32>
    %34 = vector.shape_cast %33 : vector<8xf32> to vector<8x1xf32>
    %35 = tpu.reciprocal %34 {approx = true} : vector<8x1xf32> -> vector<8x1xf32>
    %36 = vector.broadcast %35 : vector<8x1xf32> to vector<8x8xf32>
    %37 = arith.mulf %32, %36 : vector<8x8xf32>
    %38 = arith.truncf %37 : vector<8x8xf32> to vector<8x8xbf16>
    %cst_23 = arith.constant dense<0.000000e+00> : vector<8x8xf32>
    %39 = tpu.matmul %38, %22, %cst_23 {dimension_numbers = #tpu.dot_dimension_numbers<[1], [0], [0], [1], [0, 0, 1, 1], [], []>} : vector<8x8xbf16>, vector<8x8xbf16>, vector<8x8xf32> -> vector<8x8xf32>
    %40 = vector.extract_strided_slice %18 {offsets = [0, 8], sizes = [8, 8], strides = [1, 1]} : vector<8x32xbf16> to vector<8x8xbf16>
    %41 = vector.extract_strided_slice %19 {offsets = [0, 8], sizes = [8, 8], strides = [1, 1]} : vector<8x64xbf16> to vector<8x8xbf16>
    %42 = vector.extract_strided_slice %19 {offsets = [0, 40], sizes = [8, 8], strides = [1, 1]} : vector<8x64xbf16> to vector<8x8xbf16>
    %cst_24 = arith.constant dense<0.000000e+00> : vector<8x8xf32>
    %43 = tpu.matmul %40, %41, %cst_24 {dimension_numbers = #tpu.dot_dimension_numbers<[1], [1], [0], [0], [0, 0, 1, 0], [], []>} : vector<8x8xbf16>, vector<8x8xbf16>, vector<8x8xf32> -> vector<8x8xf32>
    %cst_25 = arith.constant 0.000000e+00 : f32
    %44 = vector.broadcast %cst_25 : f32 to vector<8x8xf32>
    %45 = arith.cmpf ogt, %5, %44 : vector<8x8xf32>
    %cst_26 = arith.constant -1.000000e+30 : f32
    %46 = vector.broadcast %cst_26 : f32 to vector<8x8xf32>
    %47 = arith.select %45, %43, %46 : vector<8x8xi1>, vector<8x8xf32>
    %cst_27 = arith.constant dense<0xFF800000> : vector<8xf32>
    %48 = vector.multi_reduction <maximumf>, %47, %cst_27 [1] : vector<8x8xf32> to vector<8xf32>
    %49 = vector.shape_cast %48 : vector<8xf32> to vector<8x1xf32>
    %50 = vector.broadcast %49 : vector<8x1xf32> to vector<8x8xf32>
    %51 = arith.subf %47, %50 : vector<8x8xf32>
    %52 = math.exp %51 : vector<8x8xf32>
    %cst_28 = arith.constant dense<0.000000e+00> : vector<8xf32>
    %53 = vector.multi_reduction <add>, %52, %cst_28 [1] : vector<8x8xf32> to vector<8xf32>
    %54 = vector.shape_cast %53 : vector<8xf32> to vector<8x1xf32>
    %55 = tpu.reciprocal %54 {approx = true} : vector<8x1xf32> -> vector<8x1xf32>
    %56 = vector.broadcast %55 : vector<8x1xf32> to vector<8x8xf32>
    %57 = arith.mulf %52, %56 : vector<8x8xf32>
    %58 = arith.truncf %57 : vector<8x8xf32> to vector<8x8xbf16>
    %cst_29 = arith.constant dense<0.000000e+00> : vector<8x8xf32>
    %59 = tpu.matmul %58, %42, %cst_29 {dimension_numbers = #tpu.dot_dimension_numbers<[1], [0], [0], [1], [0, 0, 1, 1], [], []>} : vector<8x8xbf16>, vector<8x8xbf16>, vector<8x8xf32> -> vector<8x8xf32>
    %60 = vector.extract_strided_slice %18 {offsets = [0, 16], sizes = [8, 8], strides = [1, 1]} : vector<8x32xbf16> to vector<8x8xbf16>
    %61 = vector.extract_strided_slice %19 {offsets = [0, 16], sizes = [8, 8], strides = [1, 1]} : vector<8x64xbf16> to vector<8x8xbf16>
    %62 = vector.extract_strided_slice %19 {offsets = [0, 48], sizes = [8, 8], strides = [1, 1]} : vector<8x64xbf16> to vector<8x8xbf16>
    %cst_30 = arith.constant dense<0.000000e+00> : vector<8x8xf32>
    %63 = tpu.matmul %60, %61, %cst_30 {dimension_numbers = #tpu.dot_dimension_numbers<[1], [1], [0], [0], [0, 0, 1, 0], [], []>} : vector<8x8xbf16>, vector<8x8xbf16>, vector<8x8xf32> -> vector<8x8xf32>
    %cst_31 = arith.constant 0.000000e+00 : f32
    %64 = vector.broadcast %cst_31 : f32 to vector<8x8xf32>
    %65 = arith.cmpf ogt, %5, %64 : vector<8x8xf32>
    %cst_32 = arith.constant -1.000000e+30 : f32
    %66 = vector.broadcast %cst_32 : f32 to vector<8x8xf32>
    %67 = arith.select %65, %63, %66 : vector<8x8xi1>, vector<8x8xf32>
    %cst_33 = arith.constant dense<0xFF800000> : vector<8xf32>
    %68 = vector.multi_reduction <maximumf>, %67, %cst_33 [1] : vector<8x8xf32> to vector<8xf32>
    %69 = vector.shape_cast %68 : vector<8xf32> to vector<8x1xf32>
    %70 = vector.broadcast %69 : vector<8x1xf32> to vector<8x8xf32>
    %71 = arith.subf %67, %70 : vector<8x8xf32>
    %72 = math.exp %71 : vector<8x8xf32>
    %cst_34 = arith.constant dense<0.000000e+00> : vector<8xf32>
    %73 = vector.multi_reduction <add>, %72, %cst_34 [1] : vector<8x8xf32> to vector<8xf32>
    %74 = vector.shape_cast %73 : vector<8xf32> to vector<8x1xf32>
    %75 = tpu.reciprocal %74 {approx = true} : vector<8x1xf32> -> vector<8x1xf32>
    %76 = vector.broadcast %75 : vector<8x1xf32> to vector<8x8xf32>
    %77 = arith.mulf %72, %76 : vector<8x8xf32>
    %78 = arith.truncf %77 : vector<8x8xf32> to vector<8x8xbf16>
    %cst_35 = arith.constant dense<0.000000e+00> : vector<8x8xf32>
    %79 = tpu.matmul %78, %62, %cst_35 {dimension_numbers = #tpu.dot_dimension_numbers<[1], [0], [0], [1], [0, 0, 1, 1], [], []>} : vector<8x8xbf16>, vector<8x8xbf16>, vector<8x8xf32> -> vector<8x8xf32>
    %80 = vector.extract_strided_slice %18 {offsets = [0, 24], sizes = [8, 8], strides = [1, 1]} : vector<8x32xbf16> to vector<8x8xbf16>
    %81 = vector.extract_strided_slice %19 {offsets = [0, 24], sizes = [8, 8], strides = [1, 1]} : vector<8x64xbf16> to vector<8x8xbf16>
    %82 = vector.extract_strided_slice %19 {offsets = [0, 56], sizes = [8, 8], strides = [1, 1]} : vector<8x64xbf16> to vector<8x8xbf16>
    %cst_36 = arith.constant dense<0.000000e+00> : vector<8x8xf32>
    %83 = tpu.matmul %80, %81, %cst_36 {dimension_numbers = #tpu.dot_dimension_numbers<[1], [1], [0], [0], [0, 0, 1, 0], [], []>} : vector<8x8xbf16>, vector<8x8xbf16>, vector<8x8xf32> -> vector<8x8xf32>
    %cst_37 = arith.constant 0.000000e+00 : f32
    %84 = vector.broadcast %cst_37 : f32 to vector<8x8xf32>
    %85 = arith.cmpf ogt, %5, %84 : vector<8x8xf32>
    %cst_38 = arith.constant -1.000000e+30 : f32
    %86 = vector.broadcast %cst_38 : f32 to vector<8x8xf32>
    %87 = arith.select %85, %83, %86 : vector<8x8xi1>, vector<8x8xf32>
    %cst_39 = arith.constant dense<0xFF800000> : vector<8xf32>
    %88 = vector.multi_reduction <maximumf>, %87, %cst_39 [1] : vector<8x8xf32> to vector<8xf32>
    %89 = vector.shape_cast %88 : vector<8xf32> to vector<8x1xf32>
    %90 = vector.broadcast %89 : vector<8x1xf32> to vector<8x8xf32>
    %91 = arith.subf %87, %90 : vector<8x8xf32>
    %92 = math.exp %91 : vector<8x8xf32>
    %cst_40 = arith.constant dense<0.000000e+00> : vector<8xf32>
    %93 = vector.multi_reduction <add>, %92, %cst_40 [1] : vector<8x8xf32> to vector<8xf32>
    %94 = vector.shape_cast %93 : vector<8xf32> to vector<8x1xf32>
    %95 = tpu.reciprocal %94 {approx = true} : vector<8x1xf32> -> vector<8x1xf32>
    %96 = vector.broadcast %95 : vector<8x1xf32> to vector<8x8xf32>
    %97 = arith.mulf %92, %96 : vector<8x8xf32>
    %98 = arith.truncf %97 : vector<8x8xf32> to vector<8x8xbf16>
    %cst_41 = arith.constant dense<0.000000e+00> : vector<8x8xf32>
    %99 = tpu.matmul %98, %82, %cst_41 {dimension_numbers = #tpu.dot_dimension_numbers<[1], [0], [0], [1], [0, 0, 1, 1], [], []>} : vector<8x8xbf16>, vector<8x8xbf16>, vector<8x8xf32> -> vector<8x8xf32>
    %100 = tpu.concatenate %39, %59, %79, %99 in 1 : vector<8x8xf32>, vector<8x8xf32>, vector<8x8xf32>, vector<8x8xf32> -> vector<8x32xf32>
    %101 = arith.truncf %100 : vector<8x32xf32> to vector<8x32xbf16>
    %c0_42 = arith.constant 0 : index
    %c0_43 = arith.constant 0 : index
    %102 = vector.load %arg8[%c0_42, %c0_43] : memref<32x32xbf16, #tpu.memory_space<vmem>>, vector<32x32xbf16>
    %cst_44 = arith.constant dense<0.000000e+00> : vector<8x32xf32>
    %103 = tpu.matmul %101, %102, %cst_44 {dimension_numbers = #tpu.dot_dimension_numbers<[1], [0], [0], [1], [0, 0, 1, 1], [], []>} : vector<8x32xbf16>, vector<32x32xbf16>, vector<8x32xf32> -> vector<8x32xf32>
    %c0_45 = arith.constant 0 : index
    %c0_46 = arith.constant 0 : index
    %104 = vector.load %arg9[%c0_45, %c0_46] : memref<1x32xf32, #tpu.memory_space<vmem>>, vector<1x32xf32>
    %105 = vector.broadcast %104 : vector<1x32xf32> to vector<8x32xf32>
    %106 = arith.addf %103, %105 : vector<8x32xf32>
    %107 = arith.extf %1 : vector<8x32xbf16> to vector<8x32xf32>
    %108 = arith.addf %106, %107 : vector<8x32xf32>
    %cst_47 = arith.constant dense<0.000000e+00> : vector<8xf32>
    %109 = vector.multi_reduction <add>, %108, %cst_47 [1] : vector<8x32xf32> to vector<8xf32>
    %110 = vector.shape_cast %109 : vector<8xf32> to vector<8x1xf32>
    %cst_48 = arith.constant 3.200000e+01 : f32
    %111 = vector.broadcast %cst_48 : f32 to vector<8x1xf32>
    %112 = arith.divf %110, %111 : vector<8x1xf32>
    %113 = vector.broadcast %112 : vector<8x1xf32> to vector<8x32xf32>
    %114 = arith.subf %108, %113 : vector<8x32xf32>
    %115 = arith.mulf %114, %114 : vector<8x32xf32>
    %cst_49 = arith.constant dense<0.000000e+00> : vector<8xf32>
    %116 = vector.multi_reduction <add>, %115, %cst_49 [1] : vector<8x32xf32> to vector<8xf32>
    %117 = vector.shape_cast %116 : vector<8xf32> to vector<8x1xf32>
    %cst_50 = arith.constant 3.200000e+01 : f32
    %118 = vector.broadcast %cst_50 : f32 to vector<8x1xf32>
    %119 = arith.divf %117, %118 : vector<8x1xf32>
    %120 = vector.broadcast %112 : vector<8x1xf32> to vector<8x32xf32>
    %121 = arith.subf %108, %120 : vector<8x32xf32>
    %cst_51 = arith.constant 9.99999974E-6 : f32
    %122 = vector.broadcast %cst_51 : f32 to vector<8x1xf32>
    %123 = arith.addf %119, %122 : vector<8x1xf32>
    %124 = math.rsqrt %123 : vector<8x1xf32>
    %125 = vector.broadcast %124 : vector<8x1xf32> to vector<8x32xf32>
    %126 = arith.mulf %121, %125 : vector<8x32xf32>
    %c0_52 = arith.constant 0 : index
    %c0_53 = arith.constant 0 : index
    %127 = vector.load %arg10[%c0_52, %c0_53] : memref<1x32xf32, #tpu.memory_space<vmem>>, vector<1x32xf32>
    %128 = vector.broadcast %127 : vector<1x32xf32> to vector<8x32xf32>
    %129 = arith.mulf %126, %128 : vector<8x32xf32>
    %c0_54 = arith.constant 0 : index
    %c0_55 = arith.constant 0 : index
    %130 = vector.load %arg11[%c0_54, %c0_55] : memref<1x32xf32, #tpu.memory_space<vmem>>, vector<1x32xf32>
    %131 = vector.broadcast %130 : vector<1x32xf32> to vector<8x32xf32>
    %132 = arith.addf %129, %131 : vector<8x32xf32>
    %133 = arith.truncf %132 : vector<8x32xf32> to vector<8x32xbf16>
    %c0_56 = arith.constant 0 : index
    %c0_57 = arith.constant 0 : index
    %c0_58 = arith.constant 0 : index
    %134 = vector.load %arg12[%c0_56, %c0_57, %c0_58] : memref<1x8x32xbf16, #tpu.memory_space<vmem>>, vector<1x8x32xbf16>
    %135 = vector.shape_cast %134 : vector<1x8x32xbf16> to vector<8x32xbf16>
    %136 = vector.shape_cast %133 : vector<8x32xbf16> to vector<1x8x32xbf16>
    tpu.vector_store %arg12[%c0_56, %c0_57, %c0_58], %136 {strides = array<i32>} : memref<1x8x32xbf16, #tpu.memory_space<vmem>>, vector<1x8x32xbf16>,
    return
  }
  func.func @transform_0(%arg0: i32) -> (i32, i32, i32) {
    %c0_i32 = arith.constant 0 : i32
    %c0_i32_0 = arith.constant 0 : i32
    %c0_i32_1 = arith.constant 0 : i32
    return %arg0, %c0_i32, %c0_i32_0 : i32, i32, i32
  }
  func.func @transform_1(%arg0: i32) -> (i32, i32, i32) {
    %c0_i32 = arith.constant 0 : i32
    %c0_i32_0 = arith.constant 0 : i32
    %c0_i32_1 = arith.constant 0 : i32
    return %arg0, %c0_i32, %c0_i32_0 : i32, i32, i32
  }
  func.func @transform_2(%arg0: i32) -> (i32, i32, i32) {
    %c0_i32 = arith.constant 0 : i32
    %c0_i32_0 = arith.constant 0 : i32
    %c0_i32_1 = arith.constant 0 : i32
    return %arg0, %c0_i32, %c0_i32_0 : i32, i32, i32
  }
  func.func @transform_3(%arg0: i32) -> (i32, i32) {
    %c0_i32 = arith.constant 0 : i32
    %c0_i32_0 = arith.constant 0 : i32
    %c0_i32_1 = arith.constant 0 : i32
    return %c0_i32, %c0_i32_0 : i32, i32
  }
  func.func @transform_4(%arg0: i32) -> (i32, i32) {
    %c0_i32 = arith.constant 0 : i32
    %c0_i32_0 = arith.constant 0 : i32
    %c0_i32_1 = arith.constant 0 : i32
    return %c0_i32, %c0_i32_0 : i32, i32
  }
  func.func @transform_5(%arg0: i32) -> (i32, i32) {
    %c0_i32 = arith.constant 0 : i32
    %c0_i32_0 = arith.constant 0 : i32
    %c0_i32_1 = arith.constant 0 : i32
    return %c0_i32, %c0_i32_0 : i32, i32
  }
  func.func @transform_6(%arg0: i32) -> (i32, i32) {
    %c0_i32 = arith.constant 0 : i32
    %c0_i32_0 = arith.constant 0 : i32
    %c0_i32_1 = arith.constant 0 : i32
    return %c0_i32, %c0_i32_0 : i32, i32
  }
  func.func @transform_7(%arg0: i32) -> (i32, i32) {
    %c0_i32 = arith.constant 0 : i32
    %c0_i32_0 = arith.constant 0 : i32
    %c0_i32_1 = arith.constant 0 : i32
    return %c0_i32, %c0_i32_0 : i32, i32
  }
  func.func @transform_8(%arg0: i32) -> (i32, i32) {
    %c0_i32 = arith.constant 0 : i32
    %c0_i32_0 = arith.constant 0 : i32
    %c0_i32_1 = arith.constant 0 : i32
    return %c0_i32, %c0_i32_0 : i32, i32
  }
  func.func @transform_9(%arg0: i32) -> (i32, i32) {
    %c0_i32 = arith.constant 0 : i32
    %c0_i32_0 = arith.constant 0 : i32
    %c0_i32_1 = arith.constant 0 : i32
    return %c0_i32, %c0_i32_0 : i32, i32
  }
  func.func @transform_10(%arg0: i32) -> (i32, i32) {
    %c0_i32 = arith.constant 0 : i32
    %c0_i32_0 = arith.constant 0 : i32
    %c0_i32_1 = arith.constant 0 : i32
    return %c0_i32, %c0_i32_0 : i32, i32
  }
  func.func @transform_11(%arg0: i32) -> (i32, i32, i32) {
    %c0_i32 = arith.constant 0 : i32
    %c0_i32_0 = arith.constant 0 : i32
    %c0_i32_1 = arith.constant 0 : i32
    return %arg0, %c0_i32, %c0_i32_0 : i32, i32, i32
  }
}

module attributes {stable_mosaic.version = 11 : i64} {
  func.func @_attn_block_kernel(%arg0: i32, %arg1: memref<1x8x32xbf16, #tpu.memory_space<vmem>>, %arg2: memref<1x8x32xbf16, #tpu.memory_space<vmem>>, %arg3: memref<1x8x8xf32, #tpu.memory_space<vmem>>, %arg4: memref<32x32xbf16, #tpu.memory_space<vmem>>, %arg5: memref<1x32xf32, #tpu.memory_space<vmem>>, %arg6: memref<32x64xbf16, #tpu.memory_space<vmem>>, %arg7: memref<1x64xf32, #tpu.memory_space<vmem>>, %arg8: memref<32x32xbf16, #tpu.memory_space<vmem>>, %arg9: memref<1x32xf32, #tpu.memory_space<vmem>>, %arg10: memref<1x32xf32, #tpu.memory_space<vmem>>, %arg11: memref<1x32xf32, #tpu.memory_space<vmem>>, %arg12: memref<1x8x32xbf16, #tpu.memory_space<vmem>>) attributes {dimension_semantics = [#tpu.dimension_semantics<parallel>], iteration_bounds = array<i64: 2>, scalar_prefetch = 0 : i64, scratch_operands = 0 : i64, tpu.core_type = #tpu.core_type<tc>, window_params = [{transform_indices = @transform_0, window_bounds = array<i64: 1, 8, 32>}, {transform_indices = @transform_1, window_bounds = array<i64: 1, 8, 32>}, {transform_indices = @transform_2, window_bounds = array<i64: 1, 8, 8>}, {pipeline_mode = #tpu.pipeline_mode<synchronous>, transform_indices = @transform_3, window_bounds = array<i64: 32, 32>}, {pipeline_mode = #tpu.pipeline_mode<synchronous>, transform_indices = @transform_4, window_bounds = array<i64: 1, 32>}, {pipeline_mode = #tpu.pipeline_mode<synchronous>, transform_indices = @transform_5, window_bounds = array<i64: 32, 64>}, {pipeline_mode = #tpu.pipeline_mode<synchronous>, transform_indices = @transform_6, window_bounds = array<i64: 1, 64>}, {pipeline_mode = #tpu.pipeline_mode<synchronous>, transform_indices = @transform_7, window_bounds = array<i64: 32, 32>}, {pipeline_mode = #tpu.pipeline_mode<synchronous>, transform_indices = @transform_8, window_bounds = array<i64: 1, 32>}, {pipeline_mode = #tpu.pipeline_mode<synchronous>, transform_indices = @transform_9, window_bounds = array<i64: 1, 32>}, {pipeline_mode = #tpu.pipeline_mode<synchronous>, transform_indices = @transform_10, window_bounds = array<i64: 1, 32>}, {transform_indices = @transform_11, window_bounds = array<i64: 1, 8, 32>}]} {
    %c0 = arith.constant 0 : index
    %c0_0 = arith.constant 0 : index
    %c0_1 = arith.constant 0 : index
    %0 = vector.load %arg1[%c0, %c0_0, %c0_1] : memref<1x8x32xbf16, #tpu.memory_space<vmem>>, vector<1x8x32xbf16>
    %1 = vector.shape_cast %0 : vector<1x8x32xbf16> to vector<8x32xbf16>
    %c0_2 = arith.constant 0 : index
    %c0_3 = arith.constant 0 : index
    %c0_4 = arith.constant 0 : index
    %2 = vector.load %arg2[%c0_2, %c0_3, %c0_4] : memref<1x8x32xbf16, #tpu.memory_space<vmem>>, vector<1x8x32xbf16>
    %3 = vector.shape_cast %2 : vector<1x8x32xbf16> to vector<8x32xbf16>
    %c0_5 = arith.constant 0 : index
    %c0_6 = arith.constant 0 : index
    %c0_7 = arith.constant 0 : index
    %4 = vector.load %arg3[%c0_5, %c0_6, %c0_7] : memref<1x8x8xf32, #tpu.memory_space<vmem>>, vector<1x8x8xf32>
    %5 = vector.shape_cast %4 : vector<1x8x8xf32> to vector<8x8xf32>
    %c0_8 = arith.constant 0 : index
    %c0_9 = arith.constant 0 : index
    %6 = vector.load %arg4[%c0_8, %c0_9] : memref<32x32xbf16, #tpu.memory_space<vmem>>, vector<32x32xbf16>
    %cst = arith.constant dense<0.000000e+00> : vector<8x32xf32>
    %7 = tpu.matmul %1, %6, %cst {dimension_numbers = #tpu.dot_dimension_numbers<[1], [0], [0], [1], [0, 0, 1, 1], [], []>} : vector<8x32xbf16>, vector<32x32xbf16>, vector<8x32xf32> -> vector<8x32xf32>
    %c0_10 = arith.constant 0 : index
    %c0_11 = arith.constant 0 : index
    %8 = vector.load %arg5[%c0_10, %c0_11] : memref<1x32xf32, #tpu.memory_space<vmem>>, vector<1x32xf32>
    %9 = vector.broadcast %8 : vector<1x32xf32> to vector<8x32xf32>
    %10 = arith.addf %7, %9 : vector<8x32xf32>
    %c0_12 = arith.constant 0 : index
    %c0_13 = arith.constant 0 : index
    %11 = vector.load %arg6[%c0_12, %c0_13] : memref<32x64xbf16, #tpu.memory_space<vmem>>, vector<32x64xbf16>
    %cst_14 = arith.constant dense<0.000000e+00> : vector<8x64xf32>
    %12 = tpu.matmul %3, %11, %cst_14 {dimension_numbers = #tpu.dot_dimension_numbers<[1], [0], [0], [1], [0, 0, 1, 1], [], []>} : vector<8x32xbf16>, vector<32x64xbf16>, vector<8x64xf32> -> vector<8x64xf32>
    %c0_15 = arith.constant 0 : index
    %c0_16 = arith.constant 0 : index
    %13 = vector.load %arg7[%c0_15, %c0_16] : memref<1x64xf32, #tpu.memory_space<vmem>>, vector<1x64xf32>
    %14 = vector.broadcast %13 : vector<1x64xf32> to vector<8x64xf32>
    %15 = arith.addf %12, %14 : vector<8x64xf32>
    %cst_17 = arith.constant 0.353553385 : f32
    %16 = vector.broadcast %cst_17 : f32 to vector<8x32xf32>
    %17 = arith.mulf %10, %16 : vector<8x32xf32>
    %18 = arith.truncf %17 : vector<8x32xf32> to vector<8x32xbf16>
    %19 = arith.truncf %15 : vector<8x64xf32> to vector<8x64xbf16>
    %20 = vector.extract_strided_slice %18 {offsets = [0, 0], sizes = [8, 8], strides = [1, 1]} : vector<8x32xbf16> to vector<8x8xbf16>
    %21 = vector.extract_strided_slice %19 {offsets = [0, 0], sizes = [8, 8], strides = [1, 1]} : vector<8x64xbf16> to vector<8x8xbf16>
    %22 = vector.extract_strided_slice %19 {offsets = [0, 32], sizes = [8, 8], strides = [1, 1]} : vector<8x64xbf16> to vector<8x8xbf16>
    %cst_18 = arith.constant dense<0.000000e+00> : vector<8x8xf32>
    %23 = tpu.matmul %20, %21, %cst_18 {dimension_numbers = #tpu.dot_dimension_numbers<[1], [1], [0], [0], [0, 0, 1, 0], [], []>} : vector<8x8xbf16>, vector<8x8xbf16>, vector<8x8xf32> -> vector<8x8xf32>
    %cst_19 = arith.constant 0.000000e+00 : f32
    %24 = vector.broadcast %cst_19 : f32 to vector<8x8xf32>
    %25 = arith.cmpf ogt, %5, %24 : vector<8x8xf32>
    %cst_20 = arith.constant -1.000000e+30 : f32
    %26 = vector.broadcast %cst_20 : f32 to vector<8x8xf32>
    %27 = arith.select %25, %23, %26 : vector<8x8xi1>, vector<8x8xf32>
    %cst_21 = arith.constant dense<0xFF800000> : vector<8xf32>
    %28 = vector.multi_reduction <maximumf>, %27, %cst_21 [1] : vector<8x8xf32> to vector<8xf32>
    %29 = vector.shape_cast %28 : vector<8xf32> to vector<8x1xf32>
    %30 = vector.broadcast %29 : vector<8x1xf32> to vector<8x8xf32>
    %31 = arith.subf %27, %30 : vector<8x8xf32>
    %32 = math.exp %31 : vector<8x8xf32>
    %cst_22 = arith.constant dense<0.000000e+00> : vector<8xf32>
    %33 = vector.multi_reduction <add>, %32, %cst_22 [1] : vector<8x8xf32> to vector<8xf32>
    %34 = vector.shape_cast %33 : vector<8xf32> to vector<8x1xf32>
    %35 = tpu.reciprocal %34 {approx = true} : vector<8x1xf32> -> vector<8x1xf32>
    %36 = vector.broadcast %35 : vector<8x1xf32> to vector<8x8xf32>
    %37 = arith.mulf %32, %36 : vector<8x8xf32>
    %38 = arith.truncf %37 : vector<8x8xf32> to vector<8x8xbf16>
    %cst_23 = arith.constant dense<0.000000e+00> : vector<8x8xf32>
    %39 = tpu.matmul %38, %22, %cst_23 {dimension_numbers = #tpu.dot_dimension_numbers<[1], [0], [0], [1], [0, 0, 1, 1], [], []>} : vector<8x8xbf16>, vector<8x8xbf16>, vector<8x8xf32> -> vector<8x8xf32>
    %40 = vector.extract_strided_slice %18 {offsets = [0, 8], sizes = [8, 8], strides = [1, 1]} : vector<8x32xbf16> to vector<8x8xbf16>
    %41 = vector.extract_strided_slice %19 {offsets = [0, 8], sizes = [8, 8], strides = [1, 1]} : vector<8x64xbf16> to vector<8x8xbf16>
    %42 = vector.extract_strided_slice %19 {offsets = [0, 40], sizes = [8, 8], strides = [1, 1]} : vector<8x64xbf16> to vector<8x8xbf16>
    %cst_24 = arith.constant dense<0.000000e+00> : vector<8x8xf32>
    %43 = tpu.matmul %40, %41, %cst_24 {dimension_numbers = #tpu.dot_dimension_numbers<[1], [1], [0], [0], [0, 0, 1, 0], [], []>} : vector<8x8xbf16>, vector<8x8xbf16>, vector<8x8xf32> -> vector<8x8xf32>
    %cst_25 = arith.constant 0.000000e+00 : f32
    %44 = vector.broadcast %cst_25 : f32 to vector<8x8xf32>
    %45 = arith.cmpf ogt, %5, %44 : vector<8x8xf32>
    %cst_26 = arith.constant -1.000000e+30 : f32
    %46 = vector.broadcast %cst_26 : f32 to vector<8x8xf32>
    %47 = arith.select %45, %43, %46 : vector<8x8xi1>, vector<8x8xf32>
    %cst_27 = arith.constant dense<0xFF800000> : vector<8xf32>
    %48 = vector.multi_reduction <maximumf>, %47, %cst_27 [1] : vector<8x8xf32> to vector<8xf32>
    %49 = vector.shape_cast %48 : vector<8xf32> to vector<8x1xf32>
    %50 = vector.broadcast %49 : vector<8x1xf32> to vector<8x8xf32>
    %51 = arith.subf %47, %50 : vector<8x8xf32>
    %52 = math.exp %51 : vector<8x8xf32>
    %cst_28 = arith.constant dense<0.000000e+00> : vector<8xf32>
    %53 = vector.multi_reduction <add>, %52, %cst_28 [1] : vector<8x8xf32> to vector<8xf32>
    %54 = vector.shape_cast %53 : vector<8xf32> to vector<8x1xf32>
    %55 = tpu.reciprocal %54 {approx = true} : vector<8x1xf32> -> vector<8x1xf32>
    %56 = vector.broadcast %55 : vector<8x1xf32> to vector<8x8xf32>
    %57 = arith.mulf %52, %56 : vector<8x8xf32>
    %58 = arith.truncf %57 : vector<8x8xf32> to vector<8x8xbf16>
    %cst_29 = arith.constant dense<0.000000e+00> : vector<8x8xf32>
    %59 = tpu.matmul %58, %42, %cst_29 {dimension_numbers = #tpu.dot_dimension_numbers<[1], [0], [0], [1], [0, 0, 1, 1], [], []>} : vector<8x8xbf16>, vector<8x8xbf16>, vector<8x8xf32> -> vector<8x8xf32>
    %60 = vector.extract_strided_slice %18 {offsets = [0, 16], sizes = [8, 8], strides = [1, 1]} : vector<8x32xbf16> to vector<8x8xbf16>
    %61 = vector.extract_strided_slice %19 {offsets = [0, 16], sizes = [8, 8], strides = [1, 1]} : vector<8x64xbf16> to vector<8x8xbf16>
    %62 = vector.extract_strided_slice %19 {offsets = [0, 48], sizes = [8, 8], strides = [1, 1]} : vector<8x64xbf16> to vector<8x8xbf16>
    %cst_30 = arith.constant dense<0.000000e+00> : vector<8x8xf32>
    %63 = tpu.matmul %60, %61, %cst_30 {dimension_numbers = #tpu.dot_dimension_numbers<[1], [1], [0], [0], [0, 0, 1, 0], [], []>} : vector<8x8xbf16>, vector<8x8xbf16>, vector<8x8xf32> -> vector<8x8xf32>
    %cst_31 = arith.constant 0.000000e+00 : f32
    %64 = vector.broadcast %cst_31 : f32 to vector<8x8xf32>
    %65 = arith.cmpf ogt, %5, %64 : vector<8x8xf32>
    %cst_32 = arith.constant -1.000000e+30 : f32
    %66 = vector.broadcast %cst_32 : f32 to vector<8x8xf32>
    %67 = arith.select %65, %63, %66 : vector<8x8xi1>, vector<8x8xf32>
    %cst_33 = arith.constant dense<0xFF800000> : vector<8xf32>
    %68 = vector.multi_reduction <maximumf>, %67, %cst_33 [1] : vector<8x8xf32> to vector<8xf32>
    %69 = vector.shape_cast %68 : vector<8xf32> to vector<8x1xf32>
    %70 = vector.broadcast %69 : vector<8x1xf32> to vector<8x8xf32>
    %71 = arith.subf %67, %70 : vector<8x8xf32>
    %72 = math.exp %71 : vector<8x8xf32>
    %cst_34 = arith.constant dense<0.000000e+00> : vector<8xf32>
    %73 = vector.multi_reduction <add>, %72, %cst_34 [1] : vector<8x8xf32> to vector<8xf32>
    %74 = vector.shape_cast %73 : vector<8xf32> to vector<8x1xf32>
    %75 = tpu.reciprocal %74 {approx = true} : vector<8x1xf32> -> vector<8x1xf32>
    %76 = vector.broadcast %75 : vector<8x1xf32> to vector<8x8xf32>
    %77 = arith.mulf %72, %76 : vector<8x8xf32>
    %78 = arith.truncf %77 : vector<8x8xf32> to vector<8x8xbf16>
    %cst_35 = arith.constant dense<0.000000e+00> : vector<8x8xf32>
    %79 = tpu.matmul %78, %62, %cst_35 {dimension_numbers = #tpu.dot_dimension_numbers<[1], [0], [0], [1], [0, 0, 1, 1], [], []>} : vector<8x8xbf16>, vector<8x8xbf16>, vector<8x8xf32> -> vector<8x8xf32>
    %80 = vector.extract_strided_slice %18 {offsets = [0, 24], sizes = [8, 8], strides = [1, 1]} : vector<8x32xbf16> to vector<8x8xbf16>
    %81 = vector.extract_strided_slice %19 {offsets = [0, 24], sizes = [8, 8], strides = [1, 1]} : vector<8x64xbf16> to vector<8x8xbf16>
    %82 = vector.extract_strided_slice %19 {offsets = [0, 56], sizes = [8, 8], strides = [1, 1]} : vector<8x64xbf16> to vector<8x8xbf16>
    %cst_36 = arith.constant dense<0.000000e+00> : vector<8x8xf32>
    %83 = tpu.matmul %80, %81, %cst_36 {dimension_numbers = #tpu.dot_dimension_numbers<[1], [1], [0], [0], [0, 0, 1, 0], [], []>} : vector<8x8xbf16>, vector<8x8xbf16>, vector<8x8xf32> -> vector<8x8xf32>
    %cst_37 = arith.constant 0.000000e+00 : f32
    %84 = vector.broadcast %cst_37 : f32 to vector<8x8xf32>
    %85 = arith.cmpf ogt, %5, %84 : vector<8x8xf32>
    %cst_38 = arith.constant -1.000000e+30 : f32
    %86 = vector.broadcast %cst_38 : f32 to vector<8x8xf32>
    %87 = arith.select %85, %83, %86 : vector<8x8xi1>, vector<8x8xf32>
    %cst_39 = arith.constant dense<0xFF800000> : vector<8xf32>
    %88 = vector.multi_reduction <maximumf>, %87, %cst_39 [1] : vector<8x8xf32> to vector<8xf32>
    %89 = vector.shape_cast %88 : vector<8xf32> to vector<8x1xf32>
    %90 = vector.broadcast %89 : vector<8x1xf32> to vector<8x8xf32>
    %91 = arith.subf %87, %90 : vector<8x8xf32>
    %92 = math.exp %91 : vector<8x8xf32>
    %cst_40 = arith.constant dense<0.000000e+00> : vector<8xf32>
    %93 = vector.multi_reduction <add>, %92, %cst_40 [1] : vector<8x8xf32> to vector<8xf32>
    %94 = vector.shape_cast %93 : vector<8xf32> to vector<8x1xf32>
    %95 = tpu.reciprocal %94 {approx = true} : vector<8x1xf32> -> vector<8x1xf32>
    %96 = vector.broadcast %95 : vector<8x1xf32> to vector<8x8xf32>
    %97 = arith.mulf %92, %96 : vector<8x8xf32>
    %98 = arith.truncf %97 : vector<8x8xf32> to vector<8x8xbf16>
    %cst_41 = arith.constant dense<0.000000e+00> : vector<8x8xf32>
    %99 = tpu.matmul %98, %82, %cst_41 {dimension_numbers = #tpu.dot_dimension_numbers<[1], [0], [0], [1], [0, 0, 1, 1], [], []>} : vector<8x8xbf16>, vector<8x8xbf16>, vector<8x8xf32> -> vector<8x8xf32>
    %100 = tpu.concatenate %39, %59, %79, %99 in 1 : vector<8x8xf32>, vector<8x8xf32>, vector<8x8xf32>, vector<8x8xf32> -> vector<8x32xf32>
    %101 = arith.truncf %100 : vector<8x32xf32> to vector<8x32xbf16>
    %c0_42 = arith.constant 0 : index
    %c0_43 = arith.constant 0 : index
    %102 = vector.load %arg8[%c0_42, %c0_43] : memref<32x32xbf16, #tpu.memory_space<vmem>>, vector<32x32xbf16>
    %cst_44 = arith.constant dense<0.000000e+00> : vector<8x32xf32>
    %103 = tpu.matmul %101, %102, %cst_44 {dimension_numbers = #tpu.dot_dimension_numbers<[1], [0], [0], [1], [0, 0, 1, 1], [], []>} : vector<8x32xbf16>, vector<32x32xbf16>, vector<8x32xf32> -> vector<8x32xf32>
    %c0_45 = arith.constant 0 : index
    %c0_46 = arith.constant 0 : index
    %104 = vector.load %arg9[%c0_45, %c0_46] : memref<1x32xf32, #tpu.memory_space<vmem>>, vector<1x32xf32>
    %105 = vector.broadcast %104 : vector<1x32xf32> to vector<8x32xf32>
    %106 = arith.addf %103, %105 : vector<8x32xf32>
    %107 = arith.extf %1 : vector<8x32xbf16> to vector<8x32xf32>
    %108 = arith.addf %106, %107 : vector<8x32xf32>
    %cst_47 = arith.constant dense<0.000000e+00> : vector<8xf32>
    %109 = vector.multi_reduction <add>, %108, %cst_47 [1] : vector<8x32xf32> to vector<8xf32>
    %110 = vector.shape_cast %109 : vector<8xf32> to vector<8x1xf32>
    %cst_48 = arith.constant 3.200000e+01 : f32
    %111 = vector.broadcast %cst_48 : f32 to vector<8x1xf32>
    %112 = arith.divf %110, %111 : vector<8x1xf32>
    %113 = vector.broadcast %112 : vector<8x1xf32> to vector<8x32xf32>
    %114 = arith.subf %108, %113 : vector<8x32xf32>
    %115 = arith.mulf %114, %114 : vector<8x32xf32>
    %cst_49 = arith.constant dense<0.000000e+00> : vector<8xf32>
    %116 = vector.multi_reduction <add>, %115, %cst_49 [1] : vector<8x32xf32> to vector<8xf32>
    %117 = vector.shape_cast %116 : vector<8xf32> to vector<8x1xf32>
    %cst_50 = arith.constant 3.200000e+01 : f32
    %118 = vector.broadcast %cst_50 : f32 to vector<8x1xf32>
    %119 = arith.divf %117, %118 : vector<8x1xf32>
    %120 = vector.broadcast %112 : vector<8x1xf32> to vector<8x32xf32>
    %121 = arith.subf %108, %120 : vector<8x32xf32>
    %cst_51 = arith.constant 9.99999974E-6 : f32
    %122 = vector.broadcast %cst_51 : f32 to vector<8x1xf32>
    %123 = arith.addf %119, %122 : vector<8x1xf32>
    %124 = math.rsqrt %123 : vector<8x1xf32>
    %125 = vector.broadcast %124 : vector<8x1xf32> to vector<8x32xf32>
    %126 = arith.mulf %121, %125 : vector<8x32xf32>
    %c0_52 = arith.constant 0 : index
    %c0_53 = arith.constant 0 : index
    %127 = vector.load %arg10[%c0_52, %c0_53] : memref<1x32xf32, #tpu.memory_space<vmem>>, vector<1x32xf32>
    %128 = vector.broadcast %127 : vector<1x32xf32> to vector<8x32xf32>
    %129 = arith.mulf %126, %128 : vector<8x32xf32>
    %c0_54 = arith.constant 0 : index
    %c0_55 = arith.constant 0 : index
    %130 = vector.load %arg11[%c0_54, %c0_55] : memref<1x32xf32, #tpu.memory_space<vmem>>, vector<1x32xf32>
    %131 = vector.broadcast %130 : vector<1x32xf32> to vector<8x32xf32>
    %132 = arith.addf %129, %131 : vector<8x32xf32>
    %133 = arith.truncf %132 : vector<8x32xf32> to vector<8x32xbf16>
    %c0_56 = arith.constant 0 : index
    %c0_57 = arith.constant 0 : index
    %c0_58 = arith.constant 0 : index
    %134 = vector.load %arg12[%c0_56, %c0_57, %c0_58] : memref<1x8x32xbf16, #tpu.memory_space<vmem>>, vector<1x8x32xbf16>
    %135 = vector.shape_cast %134 : vector<1x8x32xbf16> to vector<8x32xbf16>
    %136 = vector.shape_cast %133 : vector<8x32xbf16> to vector<1x8x32xbf16>
    tpu.vector_store %arg12[%c0_56, %c0_57, %c0_58], %136 {strides = array<i32>} : memref<1x8x32xbf16, #tpu.memory_space<vmem>>, vector<1x8x32xbf16>,
    return
  }
  func.func @transform_0(%arg0: i32) -> (i32, i32, i32) {
    %c0_i32 = arith.constant 0 : i32
    %c0_i32_0 = arith.constant 0 : i32
    %c0_i32_1 = arith.constant 0 : i32
    return %arg0, %c0_i32, %c0_i32_0 : i32, i32, i32
  }
  func.func @transform_1(%arg0: i32) -> (i32, i32, i32) {
    %c0_i32 = arith.constant 0 : i32
    %c0_i32_0 = arith.constant 0 : i32
    %c0_i32_1 = arith.constant 0 : i32
    return %arg0, %c0_i32, %c0_i32_0 : i32, i32, i32
  }
  func.func @transform_2(%arg0: i32) -> (i32, i32, i32) {
    %c0_i32 = arith.constant 0 : i32
    %c0_i32_0 = arith.constant 0 : i32
    %c0_i32_1 = arith.constant 0 : i32
    return %arg0, %c0_i32, %c0_i32_0 : i32, i32, i32
  }
  func.func @transform_3(%arg0: i32) -> (i32, i32) {
    %c0_i32 = arith.constant 0 : i32
    %c0_i32_0 = arith.constant 0 : i32
    %c0_i32_1 = arith.constant 0 : i32
    return %c0_i32, %c0_i32_0 : i32, i32
  }
  func.func @transform_4(%arg0: i32) -> (i32, i32) {
    %c0_i32 = arith.constant 0 : i32
    %c0_i32_0 = arith.constant 0 : i32
    %c0_i32_1 = arith.constant 0 : i32
    return %c0_i32, %c0_i32_0 : i32, i32
  }
  func.func @transform_5(%arg0: i32) -> (i32, i32) {
    %c0_i32 = arith.constant 0 : i32
    %c0_i32_0 = arith.constant 0 : i32
    %c0_i32_1 = arith.constant 0 : i32
    return %c0_i32, %c0_i32_0 : i32, i32
  }
  func.func @transform_6(%arg0: i32) -> (i32, i32) {
    %c0_i32 = arith.constant 0 : i32
    %c0_i32_0 = arith.constant 0 : i32
    %c0_i32_1 = arith.constant 0 : i32
    return %c0_i32, %c0_i32_0 : i32, i32
  }
  func.func @transform_7(%arg0: i32) -> (i32, i32) {
    %c0_i32 = arith.constant 0 : i32
    %c0_i32_0 = arith.constant 0 : i32
    %c0_i32_1 = arith.constant 0 : i32
    return %c0_i32, %c0_i32_0 : i32, i32
  }
  func.func @transform_8(%arg0: i32) -> (i32, i32) {
    %c0_i32 = arith.constant 0 : i32
    %c0_i32_0 = arith.constant 0 : i32
    %c0_i32_1 = arith.constant 0 : i32
    return %c0_i32, %c0_i32_0 : i32, i32
  }
  func.func @transform_9(%arg0: i32) -> (i32, i32) {
    %c0_i32 = arith.constant 0 : i32
    %c0_i32_0 = arith.constant 0 : i32
    %c0_i32_1 = arith.constant 0 : i32
    return %c0_i32, %c0_i32_0 : i32, i32
  }
  func.func @transform_10(%arg0: i32) -> (i32, i32) {
    %c0_i32 = arith.constant 0 : i32
    %c0_i32_0 = arith.constant 0 : i32
    %c0_i32_1 = arith.constant 0 : i32
    return %c0_i32, %c0_i32_0 : i32, i32
  }
  func.func @transform_11(%arg0: i32) -> (i32, i32, i32) {
    %c0_i32 = arith.constant 0 : i32
    %c0_i32_0 = arith.constant 0 : i32
    %c0_i32_1 = arith.constant 0 : i32
    return %arg0, %c0_i32, %c0_i32_0 : i32, i32, i32
  }
}

</mosaic_0001>

<bundles_post_ra>
// kernel: decoder_block_forward.5
= control target key start
LH: loop header
LB: loop body
LE: loop exit
PB: predicated region body
PF: predicated region fallthrough
CT: control target
= control target key end

     0   :  { %v312_v1 = vmov 0.0   ;;  %vm313_vm0 = vmmov 0   ;;  %s404_s0 = inlined_call_operand.vmem [shape: bf16[16,32], index: 0, kind: input, shape index: {}]   ;;  %s405_s1 = inlined_call_operand.vmem [shape: bf16[32,32], index: 1, kind: input, shape index: {}]   ;;  %s406_s2 = inlined_call_operand.vmem [shape: f32[1,32], index: 2, kind: input, shape index: {}]   ;;  %s407_s3 = inlined_call_operand.vmem [shape: bf16[32,32], index: 3, kind: input, shape index: {}]   ;;  %s408_s4 = inlined_call_operand.vmem [shape: f32[1,32], index: 4, kind: input, shape index: {}]   ;;  %s409_s5 = inlined_call_operand.vmem [shape: f32[1,32], index: 5, kind: input, shape index: {}]   ;;  %s410_s6 = inlined_call_operand.vmem [shape: f32[1,32], index: 6, kind: input, shape index: {}]   ;;  %s411_s7 = inlined_call_operand.hbm [shape: f32[16,32], index: 7, kind: output, shape index: {}]  }
   0x1   :  { %v278_v0 = vld [vmem:[%s405_s1] sm:$0xff]   ;;  %257 = vmatprep.subr.bf16.mxu0 %v312_v1  ;;  %265 = vmatprep.subr.bf16.mxu1 %v312_v1  ;;  %v279_v2 = vld [vmem:[%s405_s1 + $0x8] sm:$0xff]  }
   0x2   :  { %258 = vmatpush3.bf16.msra.mxu0 %v278_v0  ;;  %261 = vmatprep.mubr.msk.bf16.mxu0 %vm313_vm0, %v312_v1  ;;  %v28_v3 = vld [vmem:[%s404_s0] sm:$0xff]  }
   0x3   :  { %259 = vmatprep.subr.bf16.mxu0 %v312_v1  ;;  %269 = vmatprep.mubr.msk.bf16.mxu1 %vm313_vm0, %v312_v1 }
   0x4   :  { %12 = vsyncpa [#allocation3], 0  ;;  %vm58_vm1 = vcmask 261120   ;;  %v281_v4 = vld [vmem:[%s407_s3] sm:$0xff]   ;;  %v282_v5 = vld [vmem:[%s407_s3 + $0x8] sm:$0xff]   ;;  %v173_v17 = vunpack.c.l.bf16 %v28_v3  ;;  %v174_v21 = vunpack.c.h.bf16 %v28_v3  ;;  %s314_s14 = smov [#allocation2]  }
   0x5   :  { %266 = vmatpush3.bf16.msra.mxu1 %v281_v4  ;;  %v240_v6 = vld [vmem:[%s406_s2] ss:$0 sm:$0xff]  ;;  %s229_s15 = sshll.u32 %s314_s14, 4  ;;  %s230_s15 = int_to_ptr.vmem [resolvable:$true] %s229_s15 }
   0x6   :  { %260 = vmatpush3.bf16.msra.mxu0 %v279_v2  ;;  %267 = vmatprep.subr.bf16.mxu1 %v312_v1  ;;  %v245_v16 = vld [vmem:[%s408_s4] ss:$0 sm:$0xff]  ;;  %s288_s16 = scalar_lea.vmem %s230_s15, 256  ;;  %p293_p1 = scmp.lt.s32.totalorder %s230_s15, %s230_s15 }
   0x7   :  { %v249_v46 = vld [vmem:[%s409_s5] ss:$0 sm:$0xff]  ;;  %p289_p0 = scmp.ne.s32.totalorder %s230_s15, %s288_s16  ;;  %p294_p2 = scmp.lt.s32.totalorder %s288_s16, %s288_s16 }
   0x8   :  { %v250_v48 = vld [vmem:[%s410_s6] ss:$0 sm:$0xff] }
   0x9   :  { %262 = vmatmul.mubr.msk.bf16.vlgmr.msra.gmra.mrb[0].mxu0 %vm58_vm1, %v28_v3  ;;  %268 = vmatpush3.bf16.msra.mxu1 %v282_v5  ;;  %p295_p3 = por %p294_p2, %p293_p1 }
   0xb   :  { %p296_p4 = pnand %p295_p3, %p289_p0 }
  0xdc   :  { %v96_v7 = vpop.f32.mrb[0].mxu0 }
  0xdd   :  { %v97_v8 = vadd.f32 %v240_v6, %v96_v7  ;;  %v263_v9 = vpop.f32.mrb[1].mxu0 }
  0xde   :  { %v99_v10 = vpop.f32.mrb[2].mxu0 }
  0xdf   :  { %v100_v11 = vadd.f32 %v240_v6, %v99_v10  ;;  %v264_v12 = vpop.f32.mrb[3].mxu0  ;;  %v103_v13 = vmax.f32 %v97_v8, 0.0 }
  0xe1   :  { %v104_v14 = vmax.f32 %v100_v11, 0.0 }
  0xe3   :  { %v105_v15 = vpack.c.bf16 %v104_v14, %v103_v13 }
  0xe5   :  { %270 = vmatmul.mubr.msk.bf16.vlgmr.msra.gmra.mrb[0].mxu1 %vm58_vm1, %v105_v15 }
 0x1b8   :  { %v166_v18 = vpop.f32.mrb[0].mxu1 }
 0x1b9   :  { %v167_v19 = vadd.f32 %v245_v16, %v166_v18  ;;  %v271_v20 = vpop.f32.mrb[1].mxu1 }
 0x1ba   :  { %v169_v22 = vpop.f32.mrb[2].mxu1 }
 0x1bb   :  { %v170_v23 = vadd.f32 %v245_v16, %v169_v22  ;;  %v272_v24 = vpop.f32.mrb[3].mxu1  ;;  %v175_v25 = vadd.f32 %v173_v17, %v167_v19 }
 0x1bd   :  { %v177_v26 = vsel %vm58_vm1, %v175_v25, 0.0  ;;  %v176_v27 = vadd.f32 %v174_v21, %v170_v23 }
 0x1be   :  { %178 = vadd.xlane.f32.xlu0 %v177_v26 }
 0x1bf   :  { %v180_v28 = vsel %vm58_vm1, %v176_v27, 0.0 }
 0x1c2   :  { %181 = vadd.xlane.f32.xlu0 %v180_v28 }
 0x24b   :  { %v179_v29 = vpop.xlane.xlu0 %178 }
 0x24c   :  { %v184_v30 = vmul.f32 0.03125, %v179_v29 }
 0x24e   :  { %v186_v31 = vsub.f32 %v175_v25, %v184_v30 }
 0x24f   :  { %v182_v32 = vpop.xlane.xlu0 %181 }
 0x250   :  { %v185_v33 = vmul.f32 0.03125, %v182_v32  ;;  %v188_v34 = vmul.f32 %v186_v31, %v186_v31 }
 0x252   :  { %v187_v35 = vsub.f32 %v176_v27, %v185_v33  ;;  %v190_v36 = vsel %vm58_vm1, %v188_v34, 0.0 }
 0x253   :  { %191 = vadd.xlane.f32.xlu1 %v190_v36 }
 0x254   :  { %v189_v37 = vmul.f32 %v187_v35, %v187_v35 }
 0x256   :  { %v193_v38 = vsel %vm58_vm1, %v189_v37, 0.0 }
 0x257   :  { %194 = vadd.xlane.f32.xlu1 %v193_v38 }
 0x2e0   :  { %v192_v39 = vpop.xlane.xlu1 %191 }
 0x2e1   :  { %v196_v40 = vmul.f32 0.03125, %v192_v39 }
 0x2e3   :  { %v198_v41 = vadd.f32 1e-05, %v196_v40 }
 0x2e4   :  { %v195_v42 = vpop.xlane.xlu1 %194 }
 0x2e5   :  { %284 = vrsqrt.f32 %v198_v41  ;;  %v197_v43 = vmul.f32 0.03125, %v195_v42 }
 0x2e7   :  { %v199_v44 = vadd.f32 1e-05, %v197_v43 }
 0x2e9   :  { %286 = vrsqrt.f32 %v199_v44 }
 0x2ef   :  { %v285_v45 = vpop.eup %284 }
 0x2f0   :  { %v202_v47 = vmul.f32 %v285_v45, %v186_v31 }
 0x2f2   :  { %v211_v49 = vmul.f32 %v249_v46, %v202_v47 }
 0x2f3   :  { %v287_v50 = vpop.eup %286 }
 0x2f4   :  { %v203_v51 = vmul.f32 %v287_v50, %v187_v35  ;;  %v220_v52 = vadd.f32 %v250_v48, %v211_v49 }
 0x2f6   :  { %v212_v53 = vmul.f32 %v249_v46, %v203_v51  ;;  %222 = vst.msk [vmem:[#allocation2] sm:$0xff] %vm58_vm1, %v220_v52 }
 0x2f8   :  { %v221_v54 = vadd.f32 %v250_v48, %v212_v53 }
 0x2fa   :  { %223 = vst.msk [vmem:[#allocation2 + $0x8] sm:$0xff] %vm58_vm1, %v221_v54 }
 0x2fb   :  { %299 = shalt.err (!%p296_p4)
}
 0x2fc   :  { %s300_s17 = scalar_lea.hbm %s411_s7, 256 }
 0x2fd   :  { %p301_p5 = scmp.ne.s32.totalorder %s411_s7, %s300_s17  ;;  %p304_p6 = scmp.lt.u32.totalorder %s300_s17, %s411_s7 }
 0x2ff   :  { %p306_p7 = pnand %p304_p6, %p301_p5 }
 0x301   :  { %309 = shalt.err (!%p306_p7)
}
 0x302   :  { %s315_s22 = smov 128   ;;  %s316_s23 = smov 8  }
 0x303   :  { %235 = dma.vmem_to_hbm [thread:$0]  %s230_s15, 256, %s411_s7, [#allocation3], %s315_s22, %s315_s22, %s316_s23  }
 0x304   :  { %310 = dma.done.wait [#allocation3], 256  }
 0x305   :  { %311 = vsyncadd [#allocation3], 4294967040 }
 0x306   :  { %239 = vsyncpa [#allocation3], 1 }

// kernel: decoder_block_forward.3
= control target key start
LH: loop header
LB: loop body
LE: loop exit
PB: predicated region body
PF: predicated region fallthrough
CT: control target
= control target key end

     0   :  { %16 = vsyncpa [#allocation3], 0  ;;  %s1810_s0 = inlined_call_operand.vmem [shape: bf16[2,8,32], index: 0, kind: input, shape index: {}, may-alias: {0,1}]   ;;  %s1811_s1 = inlined_call_operand.vmem [shape: bf16[2,8,32], index: 1, kind: input, shape index: {}, may-alias: {0,1}]   ;;  %s1812_s2 = inlined_call_operand.vmem [shape: f32[2,8,8], index: 2, kind: input, shape index: {}]   ;;  %s1813_s3 = inlined_call_operand.vmem [shape: bf16[32,32], index: 3, kind: input, shape index: {}]   ;;  %s1814_s4 = inlined_call_operand.vmem [shape: f32[1,32], index: 4, kind: input, shape index: {}]   ;;  %s1815_s5 = inlined_call_operand.vmem [shape: bf16[32,64], index: 5, kind: input, shape index: {}]   ;;  %s1816_s6 = inlined_call_operand.hbm [shape: f32[1,64], index: 6, kind: input, shape index: {}]   ;;  %s1817_s7 = inlined_call_operand.vmem [shape: bf16[32,32], index: 7, kind: input, shape index: {}]   ;;  %s1818_s8 = inlined_call_operand.hbm [shape: f32[1,32], index: 8, kind: input, shape index: {}]   ;;  %s1819_s9 = inlined_call_operand.vmem [shape: f32[1,32], index: 9, kind: input, shape index: {}]   ;;  %s1820_s10 = inlined_call_operand.vmem [shape: f32[1,32], index: 10, kind: input, shape index: {}]   ;;  %s1821_s11 = inlined_call_operand.vmem [shape: bf16[2,8,32], index: 11, kind: output, shape index: {}]  }
   0x1   :  { %17 = vsyncpa [#allocation5], 0  ;;  %s1590_s17 = smov 0  }
   0x2 LB: > { %s1596_s18 = sadd.s32 4294967295, %s1514_s17   ;;  %p1247_p0 = scmp.ge.s32.totalorder %s1514_s17, 1  ;;  %s1514_s17 = sphi %s1590_s17, %s23_s17  }
   0x3   : > { %p300_p1 = scmp.lt.s32.totalorder %s1514_s17, 3  ;;  %p1822_p2 = scmp.eq.s32.totalorder %s1596_s18, 0 }
   0x4   : > { %s1516_s20 = smov [#allocation2]   ;;  %s1517_s22 = smov [#allocation4]  }
   0x5   : > { %p1601_p3 = pnand %p1247_p0, %p300_p1  ;;  %s322_s21 = sshll.u32 %s1516_s20, 4  ;;  %s323_s21 = int_to_ptr.vmem [resolvable:$true] %s322_s21 }
   0x6   : > { %s336_s23 = sshll.u32 %s1517_s22, 4  ;;  %s1444_s27 = scalar_lea.hbm %s1816_s6, 16  ;;  %s1613_s23 = int_to_ptr.vmem [resolvable:$true] %s336_s23 }
   0x7   : > { %s1824_s19 = scalar_select %p1601_p3, 1, 0 }
   0x8   : > { %p1387_p4 = pneg %p1601_p3  ;;  %p1445_p6 = scmp.ne.s32.totalorder %s1816_s6, %s1444_s27 }
   0x9   : > { %p1451_p10 = scmp.lt.u32.totalorder %s1444_s27, %s1816_s6 }
   0xa   : > { %p1609_p5 = pnand %p1822_p2, %p1387_p4 }
   0xc   : > { %p1446_p7 = pneg %p1609_p5 }
   0xe   : > { %p1447_p8 = pnand %p1446_p7, %p1445_p6 }
  0x10   : > { %p1448_p9 = pneg %p1447_p8 }
  0x12   : > { %p1453_p11 = pnand %p1451_p10, %p1448_p9 }
  0x14   : > { %1456 = shalt.err (!%p1453_p11)
}
  0x15   : > { %s1457_s13 = scalar_lea.vmem %s323_s21, 16  ;;  %s1464_s14 = scalar_lea.vmem %s323_s21, 32 }
  0x16   : > { %p1458_p12 = scmp.ne.s32.totalorder %s323_s21, %s1457_s13  ;;  %p1465_p1 = scmp.lt.s32.totalorder %s323_s21, %s323_s21 }
  0x17   : > { %p1466_p4 = scmp.lt.s32.totalorder %s1464_s14, %s1457_s13 }
  0x18   : > { %p1460_p13 = pnand %p1458_p12, %p1446_p7 }
  0x19   : > { %p1467_p2 = por %p1466_p4, %p1465_p1 }
  0x1a   : > { %p1461_p0 = pneg %p1460_p13 }
  0x1c   : > { %p1468_p3 = pnand %p1467_p2, %p1461_p0 }
  0x1e   : > { %1471 = shalt.err (!%p1468_p3)
}
  0x1f   : > { %1390 = dma.hbm_to_vmem [thread:$0]  (!%p1609_p5), %s1816_s6, 16, %s323_s21, [#allocation3]  }
  0x20   : > { %s1472_s25 = scalar_lea.hbm %s1818_s8, 16 }
  0x21   : > { %p1473_p6 = scmp.ne.s32.totalorder %s1818_s8, %s1472_s25  ;;  %p1479_p3 = scmp.lt.u32.totalorder %s1472_s25, %s1818_s8 }
  0x23   : > { %p1475_p8 = pnand %p1473_p6, %p1446_p7 }
  0x25   : > { %p1476_p2 = pneg %p1475_p8 }
  0x27   : > { %p1481_p9 = pnand %p1479_p3, %p1476_p2 }
  0x29   : > { %1484 = shalt.err (!%p1481_p9)
}
  0x2a   : > { %s1485_s21 = scalar_lea.vmem %s1613_s23, 16  ;;  %s1492_s30 = scalar_lea.vmem %s1613_s23, 32 }
  0x2b   : > { %p1486_p10 = scmp.ne.s32.totalorder %s1613_s23, %s1485_s21  ;;  %p1493_p13 = scmp.lt.s32.totalorder %s1613_s23, %s1613_s23 }
  0x2c   : > { %p1494_p0 = scmp.lt.s32.totalorder %s1492_s30, %s1485_s21 }
  0x2d   : > { %p1488_p11 = pnand %p1486_p10, %p1446_p7 }
  0x2e   : > { %p1495_p1 = por %p1494_p0, %p1493_p13 }
  0x2f   : > { %p1489_p12 = pneg %p1488_p11 }
  0x31   : > { %p1496_p4 = pnand %p1495_p1, %p1489_p12 }
  0x33   : > { %1499 = shalt.err (!%p1496_p4)
}
  0x34   : > { %1393 = dma.hbm_to_vmem [thread:$0]  (!%p1609_p5), %s1818_s8, 16, %s1613_s23, [#allocation5]  }
  0x35   : > { %p1826_p6 = scmp.ne.s32.totalorder %s1824_s19, 0 }
  0x36   : > { %p1827_p7 = scmp.eq.s32.totalorder (!%p1826_p6), %s1596_s18, 0 }
  0x37   : > { %376 = sbr.rel (%p1826_p6) target bundleno = 1831 (0x727), region = 64 }
  0x3e   : > { %1505 = dma.done.wait (%p1827_p7), [#allocation3], 16   ;;  %p1828_p8 = pmov %p1827_p7 }
  0x3f   : > { %p1829_p2 = pmov %p1827_p7 }
  0x40   : > { %1507 = vsyncadd (%p1828_p8), [#allocation3], 4294967280 }
  0x41   : > { %1509 = dma.done.wait (%p1829_p2), [#allocation5], 16   ;;  %p1830_p3 = pmov %p1829_p2 }
  0x42   : > { %p426_p9 = scmp.lt.s32.totalorder %s1596_s18, 1  ;;  %v1518_v0 = vmov 0.0   ;;  %vm1519_vm0 = vmmov 0   ;;  %v1420_v1 = vld [vmem:[%s1815_s5] sm:$0xff]   ;;  %v1422_v3 = vld [vmem:[%s1815_s5 + $0x8] sm:$0xff]   ;;  %vm469_vm1 = vcmask 261120  }
  0x43   : > { %1511 = vsyncadd (%p1830_p3), [#allocation5], 4294967280  ;;  %1315 = vmatprep.subr.bf16.mxu1 %v1518_v0  ;;  %1307 = vmatprep.subr.bf16.mxu0 %v1518_v0  ;;  %v1421_v2 = vld [vmem:[%s1813_s3] sm:$0xff]   ;;  %v1423_v4 = vld [vmem:[%s1813_s3 + $0x8] sm:$0xff]   ;;  %vm582_vm2 = vcmask 64512   ;;  %s1520_s19 = smov 112  }
  0x44   : > { %1319 = vmatprep.mubr.msk.bf16.mxu1 %vm1519_vm0, %v1518_v0  ;;  %1311 = vmatprep.mubr.msk.bf16.mxu0 %vm1519_vm0, %v1518_v0  ;;  %s1832_s18 = smov (!%p426_p9, %s1596_s18), 1  ;;  %v1262_v7 = vld [vmem:[#allocation2] ss:$0 sm:$0xff]  ;;  %s1521_s23 = smov 120   ;;  %vm649_vm4 = vcmask 1043456   ;;  %vm1040_vm5 = vcmask 130048  }
  0x45   : > { %s1687_s24 = sshll.u32 %s1832_s18, 2  ;;  %1316 = vmatpush3.bf16.msra.mxu1 %v1420_v1  ;;  %1308 = vmatpush3.bf16.msra.mxu0 %v1421_v2  ;;  %v1258_v8 = vld [vmem:[%s1814_s4] ss:$0 sm:$0xff]  ;;  %s1522_s14 = smov 104   ;;  %vm1042_vm6 = vcmask 195584   ;;  %vm1144_vm7 = vcmask 257024  }
  0x46   : > { %1317 = vmatprep.subr.bf16.mxu1 %v1518_v0  ;;  %s433_s28 = scalar_lea.vmem %s1811_s1, %s1687_s24  ;;  %1309 = vmatprep.subr.bf16.mxu0 %v1518_v0  ;;  %s429_s30 = scalar_lea.vmem %s1810_s0, %s1687_s24 }
  0x47   : > { %v444_v5 = vld [vmem:[%s433_s28] sm:$0xf]  ;;  %s1256_s15 = sshll.u32 %s1832_s18, 3  ;;  %s1523_s18 = smov 96  }
  0x48   : > { %v1708_v6 = vld [vmem:[%s429_s30] sm:$0xf]  ;;  %s437_s22 = scalar_lea.vmem %s1812_s2, %s1256_s15  ;;  %s1524_s25 = smov 80  }
  0x49   : > { %1318 = vmatpush3.bf16.msra.mxu1 %v1422_v3  ;;  %1310 = vmatpush3.bf16.msra.mxu0 %v1423_v4  ;;  %v445_v32 = vld [vmem:[%s437_s22] sm:$0xff]  ;;  %s1525_s26 = smov 72   ;;  %s1526_s27 = smov 88  }
  0x4a   : > { %1329 = vmatprep.subr.bf16.mxu1 %v1518_v0  ;;  %1323 = vmatprep.subr.bf16.mxu0 %v1518_v0  ;;  %vm629_vm3 = vcmp.gt.f32.partialorder %v445_v32, 0.0  ;;  %s1527_s21 = smov 8   ;;  %s1528_s13 = smov 16  }
  0x4c   : > { %1320 = vmatmul.mubr.msk.bf16.vlgmr.msra.gmra.mrb[0].mxu1 %vm469_vm1, %v444_v5  ;;  %1312 = vmatmul.mubr.msk.bf16.vlgmr.msra.gmra.mrb[0].mxu0 %vm469_vm1, %v1708_v6 }
  0x4d   : > { %1331 = vmatprep.mubr.msk.bf16.mxu1 %vm1519_vm0, %v1518_v0  ;;  %1325 = vmatprep.mubr.msk.bf16.mxu0 %vm1519_vm0, %v1518_v0 }
 0x11f   : > { %v573_v9 = vpop.f32.mrb[0].mxu1  ;;  %v507_v12 = vpop.f32.mrb[0].mxu0 }
 0x120   : > { %v574_v10 = vadd.f32 %v1262_v7, %v573_v9  ;;  %v1321_v11 = vpop.f32.mrb[1].mxu1  ;;  %v508_v13 = vadd.f32 %v1258_v8, %v507_v12  ;;  %v1313_v15 = vpop.f32.mrb[1].mxu0 }
 0x121   : > { %v576_v14 = vpop.f32.mrb[2].mxu1  ;;  %v510_v18 = vpop.f32.mrb[2].mxu0 }
 0x122   : > { %v1722_v16 = vpack.c.bf16 %v574_v10, %v574_v10  ;;  %v1322_v17 = vpop.f32.mrb[3].mxu1  ;;  %v579_v19 = vmul.f32 0.35355338, %v508_v13  ;;  %v1314_v20 = vpop.f32.mrb[3].mxu0 }
 0x124   : > { %807 = vrot.lane.b32.xlu1 %v1722_v16, %s1520_s19  ;;  %696 = vrot.lane.b32.xlu0 %v1722_v16, %s1521_s23  ;;  %v587_v21 = vsel %vm582_vm2, %v1722_v16, 0  ;;  %v580_v22 = vpack.c.bf16 %v579_v19, %v579_v19 }
 0x125   : > { %1324 = vmatpush3.bf16.xpose.msra.mxu0 %v587_v21 }
 0x126   : > { %1335 = vmatprep.subr.bf16.mxu0 %v1518_v0 }
 0x128   : > { %805 = vrot.lane.b32.xlu1 %v580_v22, %s1520_s19  ;;  %694 = vrot.lane.b32.xlu0 %v580_v22, %s1521_s23  ;;  %s1529_s19 = smov 24  }
 0x12c   : > { %916 = vrot.lane.b32.xlu1 %v580_v22, %s1522_s14  ;;  %918 = vrot.lane.b32.xlu0 %v1722_v16, %s1522_s14 }
 0x12d   : > { %1326 = vmatmul.mubr.msk.bf16.vlgmr.msra.gmra.mrb[4].mxu0 %vm582_vm2, %v580_v22 }
 0x12e   : > { %1337 = vmatprep.mubr.msk.bf16.mxu0 %vm1519_vm0, %v1518_v0 }
 0x196   : > { %v697_v23 = vpop.permute.xlu0 %696  ;;  %v808_v25 = vpop.permute.xlu1 %807 }
 0x197   : > { %v702_v24 = vsel %vm582_vm2, %v697_v23, 0  ;;  %v813_v27 = vsel %vm582_vm2, %v808_v25, 0 }
 0x198   : > { %1336 = vmatpush3.bf16.xpose.msra.mxu0 %v702_v24 }
 0x199   : > { %1347 = vmatprep.subr.bf16.mxu0 %v1518_v0 }
 0x19a   : > { %v695_v26 = vpop.permute.xlu0 %694  ;;  %v806_v29 = vpop.permute.xlu1 %805 }
 0x19e   : > { %v919_v28 = vpop.permute.xlu0 %918  ;;  %v917_v31 = vpop.permute.xlu1 %916 }
 0x19f   : > { %1338 = vmatmul.mubr.msk.bf16.vlgmr.msra.gmra.mrb[8].mxu0 %vm582_vm2, %v695_v26  ;;  %v924_v30 = vsel %vm582_vm2, %v919_v28, 0 }
 0x1a0   : > { %1348 = vmatpush3.bf16.xpose.msra.mxu0 %v813_v27  ;;  %1349 = vmatprep.mubr.msk.bf16.mxu0 %vm1519_vm0, %v1518_v0 }
 0x1a1   : > { %1359 = vmatprep.subr.bf16.mxu0 %v1518_v0 }
 0x1a7   : > { %1350 = vmatmul.mubr.msk.bf16.vlgmr.msra.gmra.mrb[12].mxu0 %vm582_vm2, %v806_v29 }
 0x1a8   : > { %1360 = vmatpush3.bf16.xpose.msra.mxu0 %v924_v30  ;;  %1361 = vmatprep.mubr.msk.bf16.mxu0 %vm1519_vm0, %v1518_v0 }
 0x1a9   : > { %1371 = vmatprep.subr.bf16.mxu0 %v1518_v0 }
 0x1af   : > { %1362 = vmatmul.mubr.msk.bf16.vlgmr.msra.gmra.mrb[16].mxu0 %vm582_vm2, %v917_v31 }
 0x1b0   : > { %1375 = vmatprep.mubr.msk.bf16.mxu0 %vm1519_vm0, %v1518_v0 }
 0x200   : > { %v623_v33 = vpop.f32.mrb[4].mxu0 }
 0x201   : > { %v630_v34 = vsel %vm629_vm3, %v623_v33, -1e+30  ;;  %v1327_v35 = vpop.f32.mrb[5].mxu0 }
 0x202   : > { %v626_v36 = vpop.f32.mrb[6].mxu0  ;;  %v631_v37 = vsel %vm582_vm2, %v630_v34, -inf }
 0x203   : > { %632 = vmax.xlane.f32.xlu0 %v631_v37  ;;  %v1328_v38 = vpop.f32.mrb[7].mxu0 }
 0x272   : > { %v738_v39 = vpop.f32.mrb[8].mxu0 }
 0x273   : > { %v744_v40 = vsel %vm629_vm3, %v738_v39, -1e+30  ;;  %v1339_v41 = vpop.f32.mrb[9].mxu0 }
 0x274   : > { %v741_v42 = vpop.f32.mrb[10].mxu0  ;;  %v745_v43 = vsel %vm582_vm2, %v744_v40, -inf }
 0x275   : > { %746 = vmax.xlane.f32.xlu1 %v745_v43  ;;  %v1340_v44 = vpop.f32.mrb[11].mxu0  ;;  %v1424_v43 = vld [vmem:[%s1817_s7] sm:$0xff]  }
 0x276   : > { %1372 = vmatpush3.bf16.msra.mxu0 %v1424_v43 }
 0x277   : > { %1373 = vmatprep.subr.bf16.mxu0 %v1518_v0 }
 0x27a   : > { %v849_v45 = vpop.f32.mrb[12].mxu0 }
 0x27b   : > { %v855_v46 = vsel %vm629_vm3, %v849_v45, -1e+30  ;;  %v1351_v47 = vpop.f32.mrb[13].mxu0 }
 0x27c   : > { %v852_v48 = vpop.f32.mrb[14].mxu0  ;;  %v856_v49 = vsel %vm582_vm2, %v855_v46, -inf }
 0x27d   : > { %857 = vmax.xlane.f32.xlu0 %v856_v49  ;;  %v1352_v50 = vpop.f32.mrb[15].mxu0  ;;  %v1425_v48 = vld [vmem:[%s1817_s7 + $0x8] sm:$0xff]  }
 0x27e   : > { %1374 = vmatpush3.bf16.msra.mxu0 %v1425_v48 }
 0x282   : > { %v960_v51 = vpop.f32.mrb[16].mxu0 }
 0x283   : > { %v966_v52 = vsel %vm629_vm3, %v960_v51, -1e+30  ;;  %v1363_v53 = vpop.f32.mrb[17].mxu0 }
 0x284   : > { %v963_v54 = vpop.f32.mrb[18].mxu0  ;;  %v967_v55 = vsel %vm582_vm2, %v966_v52, -inf }
 0x285   : > { %968 = vmax.xlane.f32.xlu0 %v967_v55  ;;  %v1364_v56 = vpop.f32.mrb[19].mxu0 }
 0x290   : > { %v633_v57 = vpop.xlane.xlu0 %632 }
 0x291   : > { %v634_v58 = vsub.f32 %v630_v34, %v633_v57 }
 0x293   : > { %v635_v59 = vmul.f32 1.442695, %v634_v58 }
 0x295   : > { %1426 = vpow2.f32 %v635_v59 }
 0x29f   : > { %v1427_v60 = vpop.eup %1426 }
 0x2a0   : > { %v637_v61 = vsel %vm582_vm2, %v1427_v60, 0.0 }
 0x2a1   : > { %638 = vadd.xlane.f32.xlu1 %v637_v61 }
 0x2b2   : > { %644 = vrot.lane.b32.xlu1 %v1722_v16, %s1523_s18  ;;  %s441_s18 = scalar_lea.vmem %s1821_s11, %s1687_s24 }
 0x302   : > { %v747_v62 = vpop.xlane.xlu1 %746 }
 0x303   : > { %v748_v63 = vsub.f32 %v744_v40, %v747_v62 }
 0x305   : > { %v749_v1 = vmul.f32 1.442695, %v748_v63  ;;  %v1274_v63 = vld [vmem:[#allocation4] ss:$0 sm:$0xff] }
 0x307   : > { %1428 = vpow2.f32 %v749_v1  ;;  %v1111_v1 = vunpack.c.l.bf16 %v1708_v6 }
 0x30a   : > { %v858_v2 = vpop.xlane.xlu0 %857 }
 0x30b   : > { %v859_v3 = vsub.f32 %v855_v46, %v858_v2 }
 0x30d   : > { %v860_v4 = vmul.f32 1.442695, %v859_v3 }
 0x30f   : > { %1430 = vpow2.f32 %v860_v4 }
 0x311   : > { %v1429_v5 = vpop.eup %1428 }
 0x312   : > { %v969_v7 = vpop.xlane.xlu0 %968  ;;  %v751_v8 = vsel %vm582_vm2, %v1429_v5, 0.0 }
 0x313   : > { %v970_v9 = vsub.f32 %v966_v52, %v969_v7  ;;  %752 = vadd.xlane.f32.xlu0 %v751_v8 }
 0x315   : > { %v971_v10 = vmul.f32 1.442695, %v970_v9 }
 0x317   : > { %1432 = vpow2.f32 %v971_v10 }
 0x319   : > { %v1431_v11 = vpop.eup %1430 }
 0x31a   : > { %v862_v12 = vsel %vm582_vm2, %v1431_v11, 0.0 }
 0x31b   : > { %863 = vadd.xlane.f32.xlu1 %v862_v12 }
 0x321   : > { %v1433_v13 = vpop.eup %1432 }
 0x322   : > { %v973_v14 = vsel %vm582_vm2, %v1433_v13, 0.0 }
 0x323   : > { %974 = vadd.xlane.f32.xlu0 %v973_v14 }
 0x32c   : > { %868 = vrot.lane.b32.xlu1 %v1722_v16, %s1524_s25 }
 0x32e   : > { %v639_v15 = vpop.xlane.xlu1 %638 }
 0x32f   : > { %1434 = vrcp.f32 %v639_v15 }
 0x330   : > { %979 = vrot.lane.b32.xlu1 %v1722_v16, %s1525_s26 }
 0x332   : > { %v645_v17 = vpop.permute.xlu1 %644 }
 0x333   : > { %v651_v18 = vsel %vm649_vm4, %v645_v17, 0 }
 0x334   : > { %1330 = vmatpush3.bf16.msra.mxu1 %v651_v18 }
 0x335   : > { %1341 = vmatprep.subr.bf16.mxu1 %v1518_v0 }
 0x339   : > { %v1435_v19 = vpop.eup %1434  ;;  %757 = vrot.lane.b32.xlu0 %v1722_v16, %s1526_s27 }
 0x33a   : > { %v641_v20 = vmul.f32 %v1435_v19, %v1427_v60  ;;  %v1278_v19 = vld [vmem:[%s1819_s9] ss:$0 sm:$0xff] }
 0x33c   : > { %v642_v21 = vpack.c.bf16 %v641_v20, %v641_v20 }
 0x33e   : > { %1332 = vmatmul.mubr.msk.bf16.vlgmr.msra.gmra.mrb[4].mxu1 %vm582_vm2, %v642_v21  ;;  %v1279_v21 = vld [vmem:[%s1820_s10] ss:$0 sm:$0xff] }
 0x33f   : > { %1343 = vmatprep.mubr.msk.bf16.mxu1 %vm1519_vm0, %v1518_v0 }
 0x3a0   : > { %v753_v22 = vpop.xlane.xlu0 %752 }
 0x3a1   : > { %1436 = vrcp.f32 %v753_v22 }
 0x3a8   : > { %v864_v23 = vpop.xlane.xlu1 %863 }
 0x3a9   : > { %1438 = vrcp.f32 %v864_v23 }
 0x3ab   : > { %v1437_v24 = vpop.eup %1436 }
 0x3ac   : > { %v755_v26 = vmul.f32 %v1437_v24, %v1429_v5  ;;  %v869_v29 = vpop.permute.xlu1 %868 }
 0x3ad   : > { %v874_v31 = vsel %vm649_vm4, %v869_v29, 0 }
 0x3ae   : > { %v756_v16 = vpack.c.bf16 %v755_v26, %v755_v26 }
 0x3b0   : > { %v975_v25 = vpop.xlane.xlu0 %974  ;;  %v980_v33 = vpop.permute.xlu1 %979 }
 0x3b1   : > { %1440 = vrcp.f32 %v975_v25  ;;  %v985_v36 = vsel %vm649_vm4, %v980_v33, 0 }
 0x3b3   : > { %v1439_v30 = vpop.eup %1438 }
 0x3b4   : > { %v758_v27 = vpop.permute.xlu0 %757  ;;  %v866_v32 = vmul.f32 %v1439_v30, %v1431_v11 }
 0x3b5   : > { %v763_v28 = vsel %vm649_vm4, %v758_v27, 0 }
 0x3b6   : > { %1342 = vmatpush3.bf16.msra.mxu1 %v763_v28  ;;  %v867_v34 = vpack.c.bf16 %v866_v32, %v866_v32 }
 0x3b7   : > { %1353 = vmatprep.subr.bf16.mxu1 %v1518_v0 }
 0x3b9   : > { %1344 = vmatmul.mubr.msk.bf16.vlgmr.msra.gmra.mrb[8].mxu1 %vm582_vm2, %v756_v16 }
 0x3ba   : > { %1354 = vmatpush3.bf16.msra.mxu1 %v874_v31  ;;  %1355 = vmatprep.mubr.msk.bf16.mxu1 %vm1519_vm0, %v1518_v0 }
 0x3bb   : > { %1365 = vmatprep.subr.bf16.mxu1 %v1518_v0  ;;  %v1441_v35 = vpop.eup %1440 }
 0x3bc   : > { %v977_v37 = vmul.f32 %v1441_v35, %v1433_v13 }
 0x3be   : > { %v978_v38 = vpack.c.bf16 %v977_v37, %v977_v37 }
 0x3c1   : > { %1356 = vmatmul.mubr.msk.bf16.vlgmr.msra.gmra.mrb[12].mxu1 %vm582_vm2, %v867_v34 }
 0x3c2   : > { %1366 = vmatpush3.bf16.msra.mxu1 %v985_v36  ;;  %1367 = vmatprep.mubr.msk.bf16.mxu1 %vm1519_vm0, %v1518_v0 }
 0x3c9   : > { %1368 = vmatmul.mubr.msk.bf16.vlgmr.msra.gmra.mrb[16].mxu1 %vm582_vm2, %v978_v38 }
 0x411   : > { %v687_v39 = vpop.f32.mrb[4].mxu1 }
 0x412   : > { %v1333_v40 = vpop.f32.mrb[5].mxu1 }
 0x413   : > { %v690_v41 = vpop.f32.mrb[6].mxu1 }
 0x414   : > { %v1334_v42 = vpop.f32.mrb[7].mxu1 }
 0x48c   : > { %v799_v44 = vpop.f32.mrb[8].mxu1 }
 0x48d   : > { %1028 = vrot.lane.b32.xlu0 %v799_v44, %s1527_s21  ;;  %v1345_v45 = vpop.f32.mrb[9].mxu1 }
 0x48e   : > { %v802_v46 = vpop.f32.mrb[10].mxu1 }
 0x48f   : > { %v1346_v47 = vpop.f32.mrb[11].mxu1 }
 0x494   : > { %v910_v49 = vpop.f32.mrb[12].mxu1 }
 0x495   : > { %1032 = vrot.lane.b32.xlu1 %v910_v49, %s1528_s13  ;;  %v1357_v50 = vpop.f32.mrb[13].mxu1 }
 0x496   : > { %v913_v51 = vpop.f32.mrb[14].mxu1 }
 0x497   : > { %v1358_v52 = vpop.f32.mrb[15].mxu1 }
 0x49c   : > { %v1021_v53 = vpop.f32.mrb[16].mxu1 }
 0x49d   : > { %1036 = vrot.lane.b32.xlu0 %v1021_v53, %s1529_s19  ;;  %v1369_v0 = vpop.f32.mrb[17].mxu1 }
 0x49e   : > { %v1024_v54 = vpop.f32.mrb[18].mxu1 }
 0x49f   : > { %v1370_v55 = vpop.f32.mrb[19].mxu1 }
 0x4ff   : > { %v1029_v56 = vpop.permute.xlu0 %1028 }
 0x500   : > { %v1039_v58 = vsel %vm582_vm2, %v687_v39, %v1029_v56 }
 0x507   : > { %v1033_v57 = vpop.permute.xlu1 %1032 }
 0x508   : > { %v1041_v59 = vsel %vm1040_vm5, %v1039_v58, %v1033_v57 }
 0x50f   : > { %v1037_v60 = vpop.permute.xlu0 %1036 }
 0x510   : > { %v1043_v61 = vsel %vm1042_vm6, %v1041_v59, %v1037_v60 }
 0x511   : > { %v1044_v62 = vpack.c.bf16 %v1043_v61, %v1043_v61 }
 0x513   : > { %1376 = vmatmul.mubr.msk.bf16.vlgmr.msra.gmra.mrb[20].mxu0 %vm469_vm1, %v1044_v62 }
 0x5e6   : > { %v1105_v2 = vpop.f32.mrb[20].mxu0 }
 0x5e7   : > { %v1106_v3 = vadd.f32 %v1274_v63, %v1105_v2  ;;  %v1377_v4 = vpop.f32.mrb[21].mxu0 }
 0x5e8   : > { %v1108_v5 = vpop.f32.mrb[22].mxu0 }
 0x5e9   : > { %v1378_v7 = vpop.f32.mrb[23].mxu0  ;;  %v1112_v8 = vadd.f32 %v1111_v1, %v1106_v3 }
 0x5eb   : > { %v1113_v9 = vsel %vm469_vm1, %v1112_v8, 0.0 }
 0x5ec   : > { %1114 = vadd.xlane.f32.xlu1 %v1113_v9 }
 0x679   : > { %v1115_v10 = vpop.xlane.xlu1 %1114 }
 0x67a   : > { %v1117_v11 = vmul.f32 0.03125, %v1115_v10 }
 0x67c   : > { %v1118_v12 = vsub.f32 %v1112_v8, %v1117_v11 }
 0x67e   : > { %v1119_v13 = vmul.f32 %v1118_v12, %v1118_v12 }
 0x680   : > { %v1120_v14 = vsel %vm469_vm1, %v1119_v13, 0.0 }
 0x681   : > { %1121 = vadd.xlane.f32.xlu0 %v1120_v14 }
 0x70e   : > { %v1122_v15 = vpop.xlane.xlu0 %1121 }
 0x70f   : > { %v1123_v17 = vmul.f32 0.03125, %v1122_v15 }
 0x711   : > { %v1124_v6 = vadd.f32 1e-05, %v1123_v17 }
 0x713   : > { %1442 = vrsqrt.f32 %v1124_v6 }
 0x71d   : > { %v1443_v18 = vpop.eup %1442 }
 0x71e   : > { %v1126_v20 = vmul.f32 %v1443_v18, %v1118_v12 }
 0x720   : > { %v1134_v22 = vmul.f32 %v1278_v19, %v1126_v20 }
 0x722   : > { %v1142_v23 = vadd.f32 %v1279_v21, %v1134_v22 }
 0x724   : > { %v1143_v24 = vpack.c.bf16 %v1142_v23, %v1142_v23 }
 0x726   : > { %1145 = vst.msk [vmem:[%s441_s18] sm:$0xf] %vm1144_vm7, %v1143_v24 }
 0x727 PF: > { %s23_s17 = sadd.s32 1, %s1514_s17  }
 0x728   : > { %p20_p5 = scmp.ge.s32.totalorder %s23_s17, 4  }
 0x72a   :  { %22 = sbr.rel (!%p20_p5) target bundleno = 2 (0x2), region = 109 }
 0x731   :  { %1165 = vsyncpa [#allocation3], 1 }
 0x732   :  { %1167 = vsyncpa [#allocation3 + $0x1], 1 }
 0x733   :  { %1168 = vsyncpa [#allocation5], 1 }

// kernel: decoder_block_forward.4
= control target key start
LH: loop header
LB: loop body
LE: loop exit
PB: predicated region body
PF: predicated region fallthrough
CT: control target
= control target key end

     0   :  { %s1451_s17 = smov 0   ;;  %s1600_s0 = inlined_call_operand.vmem [shape: bf16[2,8,32], index: 0, kind: input, shape index: {}]   ;;  %s1601_s1 = inlined_call_operand.vmem [shape: bf16[2,8,32], index: 1, kind: input, shape index: {}]   ;;  %s1602_s2 = inlined_call_operand.vmem [shape: f32[2,8,8], index: 2, kind: input, shape index: {}]   ;;  %s1603_s3 = inlined_call_operand.vmem [shape: bf16[32,32], index: 3, kind: input, shape index: {}]   ;;  %s1604_s4 = inlined_call_operand.vmem [shape: f32[1,32], index: 4, kind: input, shape index: {}]   ;;  %s1605_s5 = inlined_call_operand.vmem [shape: bf16[32,64], index: 5, kind: input, shape index: {}]   ;;  %s1606_s6 = inlined_call_operand.vmem [shape: f32[1,64], index: 6, kind: input, shape index: {}]   ;;  %s1607_s7 = inlined_call_operand.vmem [shape: bf16[32,32], index: 7, kind: input, shape index: {}]   ;;  %s1608_s8 = inlined_call_operand.vmem [shape: f32[1,32], index: 8, kind: input, shape index: {}]   ;;  %s1609_s9 = inlined_call_operand.vmem [shape: f32[1,32], index: 9, kind: input, shape index: {}]   ;;  %s1610_s10 = inlined_call_operand.vmem [shape: f32[1,32], index: 10, kind: input, shape index: {}]   ;;  %s1611_s11 = inlined_call_operand.vmem [shape: bf16[2,8,32], index: 11, kind: output, shape index: {}]  }
   0x1 LB: > { %s1197_s18 = sadd.s32 4294967295, %s1377_s17   ;;  %p1201_p0 = scmp.ge.s32.totalorder %s1377_s17, 1  ;;  %s1377_s17 = sphi %s1451_s17, %s21_s17  }
   0x2   : > { %p354_p1 = scmp.lt.s32.totalorder %s1377_s17, 3 }
   0x4   : > { %p355_p2 = pnand %p1201_p0, %p354_p1 }
   0x5   : > { %v1347_v0 = vld [vmem:[%s1605_s5] sm:$0xff] (!%p355_p2)   ;;  %v1379_v1 = vmov (!%p355_p2), 0.0   ;;  %v1349_v3 = vld [vmem:[%s1605_s5 + $0x8] sm:$0xff] (!%p355_p2)   ;;  %vm1380_vm0 = vmmov (!%p355_p2), 0   ;;  %p400_p3 = scmp.lt.s32.totalorder (!%p355_p2), %s1197_s18, 1  ;;  %vm443_vm1 = vcmask (!%p355_p2), 261120  }
   0x6   : > { %358 = sbr.rel (%p355_p2) target bundleno = 1772 (0x6ec), region = 64  ;;  %1263 = vmatprep.subr.bf16.mxu1 (!%p355_p2), %v1379_v1  ;;  %1255 = vmatprep.subr.bf16.mxu0 (!%p355_p2), %v1379_v1  ;;  %v1348_v2 = vld [vmem:[%s1603_s3] sm:$0xff] (!%p355_p2)   ;;  %v1350_v4 = vld [vmem:[%s1603_s3 + $0x8] sm:$0xff] (!%p355_p2)   ;;  %vm556_vm2 = vcmask (!%p355_p2), 64512   ;;  %s1381_s21 = smov (!%p355_p2), 112   ;;  %vm623_vm4 = vcmask (!%p355_p2), 1043456  }
   0x7   : > { %1264 = vmatpush3.bf16.msra.mxu1 (!%p355_p2), %v1347_v0  ;;  %1267 = vmatprep.mubr.msk.bf16.mxu1 (!%p355_p2), %vm1380_vm0, %v1379_v1  ;;  %v1210_v7 = vld [vmem:[%s1606_s6] ss:$0 sm:$0xff] (!%p355_p2)  ;;  %s1382_s22 = smov (!%p355_p2), 120   ;;  %s1383_s23 = smov (!%p355_p2), 104   ;;  %vm1014_vm5 = vcmask (!%p355_p2), 130048   ;;  %vm1016_vm6 = vcmask (!%p355_p2), 195584  }
   0x8   : > { %1256 = vmatpush3.bf16.msra.mxu0 (!%p355_p2), %v1348_v2  ;;  %1265 = vmatprep.subr.bf16.mxu1 (!%p355_p2), %v1379_v1  ;;  %v1206_v8 = vld [vmem:[%s1604_s4] ss:$0 sm:$0xff] (!%p355_p2)  ;;  %s1385_s29 = smov (!%p355_p2), 80   ;;  %s1387_s12 = smov (!%p355_p2), 88   ;;  %vm1118_vm7 = vcmask (!%p355_p2), 257024  }
   0x9   : > { %1257 = vmatprep.subr.bf16.mxu0 (!%p355_p2), %v1379_v1  ;;  %1259 = vmatprep.mubr.msk.bf16.mxu0 (!%p355_p2), %vm1380_vm0, %v1379_v1  ;;  %s1388_s15 = smov (!%p355_p2), 8   ;;  %s1389_s20 = smov (!%p355_p2), 16  }
   0xb   : > { %1266 = vmatpush3.bf16.msra.mxu1 (!%p355_p2), %v1349_v3 }
   0xc   : > { %1258 = vmatpush3.bf16.msra.mxu0 (!%p355_p2), %v1350_v4  ;;  %1277 = vmatprep.subr.bf16.mxu1 (!%p355_p2), %v1379_v1 }
   0xd   : > { %s1613_s18 = smov (!%p400_p3, %s1197_s18), 1  ;;  %1271 = vmatprep.subr.bf16.mxu0 %v1379_v1 }
   0xe   : > { %s1482_s27 = sshll.u32 %s1613_s18, 2  ;;  %s1204_s24 = sshll.u32 %s1613_s18, 3 }
   0xf   : > { %s407_s30 = scalar_lea.vmem %s1601_s1, %s1482_s27  ;;  %s403_s14 = scalar_lea.vmem %s1600_s0, %s1482_s27 }
  0x10   : > { %v418_v5 = vld [vmem:[%s407_s30] sm:$0xf]  ;;  %s411_s28 = scalar_lea.vmem %s1602_s2, %s1204_s24  ;;  %s1384_s18 = smov 96  }
  0x11   : > { %1268 = vmatmul.mubr.msk.bf16.vlgmr.msra.gmra.mrb[0].mxu1 %vm443_vm1, %v418_v5  ;;  %v1495_v6 = vld [vmem:[%s403_s14] sm:$0xf]  ;;  %s1386_s30 = smov 72  }
  0x12   : > { %1260 = vmatmul.mubr.msk.bf16.vlgmr.msra.gmra.mrb[0].mxu0 %vm443_vm1, %v1495_v6  ;;  %1279 = vmatprep.mubr.msk.bf16.mxu1 %vm1380_vm0, %v1379_v1  ;;  %v419_v32 = vld [vmem:[%s411_s28] sm:$0xff] }
  0x13   : > { %1273 = vmatprep.mubr.msk.bf16.mxu0 %vm1380_vm0, %v1379_v1  ;;  %vm603_vm3 = vcmp.gt.f32.partialorder %v419_v32, 0.0 }
  0xe4   : > { %v547_v9 = vpop.f32.mrb[0].mxu1 }
  0xe5   : > { %v548_v10 = vadd.f32 %v1210_v7, %v547_v9  ;;  %v1269_v11 = vpop.f32.mrb[1].mxu1  ;;  %v481_v12 = vpop.f32.mrb[0].mxu0 }
  0xe6   : > { %v482_v13 = vadd.f32 %v1206_v8, %v481_v12  ;;  %v550_v14 = vpop.f32.mrb[2].mxu1  ;;  %v1261_v15 = vpop.f32.mrb[1].mxu0 }
  0xe7   : > { %v1509_v16 = vpack.c.bf16 %v548_v10, %v548_v10  ;;  %v1270_v17 = vpop.f32.mrb[3].mxu1  ;;  %v484_v18 = vpop.f32.mrb[2].mxu0 }
  0xe8   : > { %v553_v19 = vmul.f32 0.35355338, %v482_v13  ;;  %v1262_v20 = vpop.f32.mrb[3].mxu0 }
  0xe9   : > { %781 = vrot.lane.b32.xlu1 %v1509_v16, %s1381_s21  ;;  %670 = vrot.lane.b32.xlu0 %v1509_v16, %s1382_s22  ;;  %v561_v21 = vsel %vm556_vm2, %v1509_v16, 0 }
  0xea   : > { %v554_v22 = vpack.c.bf16 %v553_v19, %v553_v19  ;;  %1272 = vmatpush3.bf16.xpose.msra.mxu0 %v561_v21 }
  0xeb   : > { %1283 = vmatprep.subr.bf16.mxu0 %v1379_v1 }
  0xed   : > { %779 = vrot.lane.b32.xlu1 %v554_v22, %s1381_s21  ;;  %668 = vrot.lane.b32.xlu0 %v554_v22, %s1382_s22  ;;  %s1390_s21 = smov 24  }
  0xf1   : > { %890 = vrot.lane.b32.xlu1 %v554_v22, %s1383_s23  ;;  %892 = vrot.lane.b32.xlu0 %v1509_v16, %s1383_s23 }
  0xf2   : > { %1274 = vmatmul.mubr.msk.bf16.vlgmr.msra.gmra.mrb[4].mxu0 %vm556_vm2, %v554_v22 }
  0xf3   : > { %1285 = vmatprep.mubr.msk.bf16.mxu0 %vm1380_vm0, %v1379_v1 }
 0x15b   : > { %v671_v23 = vpop.permute.xlu0 %670  ;;  %v782_v25 = vpop.permute.xlu1 %781 }
 0x15c   : > { %v676_v24 = vsel %vm556_vm2, %v671_v23, 0  ;;  %v787_v27 = vsel %vm556_vm2, %v782_v25, 0 }
 0x15d   : > { %1284 = vmatpush3.bf16.xpose.msra.mxu0 %v676_v24 }
 0x15e   : > { %1295 = vmatprep.subr.bf16.mxu0 %v1379_v1 }
 0x15f   : > { %v669_v26 = vpop.permute.xlu0 %668  ;;  %v780_v29 = vpop.permute.xlu1 %779 }
 0x163   : > { %v893_v28 = vpop.permute.xlu0 %892  ;;  %v891_v31 = vpop.permute.xlu1 %890 }
 0x164   : > { %1286 = vmatmul.mubr.msk.bf16.vlgmr.msra.gmra.mrb[8].mxu0 %vm556_vm2, %v669_v26  ;;  %v898_v30 = vsel %vm556_vm2, %v893_v28, 0 }
 0x165   : > { %1296 = vmatpush3.bf16.xpose.msra.mxu0 %v787_v27  ;;  %1297 = vmatprep.mubr.msk.bf16.mxu0 %vm1380_vm0, %v1379_v1 }
 0x166   : > { %1307 = vmatprep.subr.bf16.mxu0 %v1379_v1 }
 0x16c   : > { %1298 = vmatmul.mubr.msk.bf16.vlgmr.msra.gmra.mrb[12].mxu0 %vm556_vm2, %v780_v29 }
 0x16d   : > { %1308 = vmatpush3.bf16.xpose.msra.mxu0 %v898_v30  ;;  %1309 = vmatprep.mubr.msk.bf16.mxu0 %vm1380_vm0, %v1379_v1 }
 0x16e   : > { %1319 = vmatprep.subr.bf16.mxu0 %v1379_v1 }
 0x174   : > { %1310 = vmatmul.mubr.msk.bf16.vlgmr.msra.gmra.mrb[16].mxu0 %vm556_vm2, %v891_v31 }
 0x175   : > { %1323 = vmatprep.mubr.msk.bf16.mxu0 %vm1380_vm0, %v1379_v1 }
 0x1c5   : > { %v597_v33 = vpop.f32.mrb[4].mxu0 }
 0x1c6   : > { %v604_v34 = vsel %vm603_vm3, %v597_v33, -1e+30  ;;  %v1275_v35 = vpop.f32.mrb[5].mxu0 }
 0x1c7   : > { %v600_v36 = vpop.f32.mrb[6].mxu0  ;;  %v605_v37 = vsel %vm556_vm2, %v604_v34, -inf }
 0x1c8   : > { %606 = vmax.xlane.f32.xlu0 %v605_v37  ;;  %v1276_v38 = vpop.f32.mrb[7].mxu0 }
 0x237   : > { %v712_v39 = vpop.f32.mrb[8].mxu0 }
 0x238   : > { %v718_v40 = vsel %vm603_vm3, %v712_v39, -1e+30  ;;  %v1287_v41 = vpop.f32.mrb[9].mxu0 }
 0x239   : > { %v715_v42 = vpop.f32.mrb[10].mxu0  ;;  %v719_v43 = vsel %vm556_vm2, %v718_v40, -inf }
 0x23a   : > { %720 = vmax.xlane.f32.xlu1 %v719_v43  ;;  %v1288_v44 = vpop.f32.mrb[11].mxu0  ;;  %v1351_v43 = vld [vmem:[%s1607_s7] sm:$0xff]  }
 0x23b   : > { %1320 = vmatpush3.bf16.msra.mxu0 %v1351_v43 }
 0x23c   : > { %1321 = vmatprep.subr.bf16.mxu0 %v1379_v1 }
 0x23f   : > { %v823_v45 = vpop.f32.mrb[12].mxu0 }
 0x240   : > { %v829_v46 = vsel %vm603_vm3, %v823_v45, -1e+30  ;;  %v1299_v47 = vpop.f32.mrb[13].mxu0 }
 0x241   : > { %v826_v48 = vpop.f32.mrb[14].mxu0  ;;  %v830_v49 = vsel %vm556_vm2, %v829_v46, -inf }
 0x242   : > { %831 = vmax.xlane.f32.xlu0 %v830_v49  ;;  %v1300_v50 = vpop.f32.mrb[15].mxu0  ;;  %v1352_v48 = vld [vmem:[%s1607_s7 + $0x8] sm:$0xff]  }
 0x243   : > { %1322 = vmatpush3.bf16.msra.mxu0 %v1352_v48 }
 0x247   : > { %v934_v51 = vpop.f32.mrb[16].mxu0 }
 0x248   : > { %v940_v52 = vsel %vm603_vm3, %v934_v51, -1e+30  ;;  %v1311_v53 = vpop.f32.mrb[17].mxu0 }
 0x249   : > { %v937_v54 = vpop.f32.mrb[18].mxu0  ;;  %v941_v55 = vsel %vm556_vm2, %v940_v52, -inf }
 0x24a   : > { %942 = vmax.xlane.f32.xlu0 %v941_v55  ;;  %v1312_v56 = vpop.f32.mrb[19].mxu0 }
 0x255   : > { %v607_v57 = vpop.xlane.xlu0 %606 }
 0x256   : > { %v608_v58 = vsub.f32 %v604_v34, %v607_v57 }
 0x258   : > { %v609_v59 = vmul.f32 1.442695, %v608_v58 }
 0x25a   : > { %1353 = vpow2.f32 %v609_v59 }
 0x264   : > { %v1354_v60 = vpop.eup %1353 }
 0x265   : > { %v611_v61 = vsel %vm556_vm2, %v1354_v60, 0.0 }
 0x266   : > { %612 = vadd.xlane.f32.xlu1 %v611_v61 }
 0x277   : > { %618 = vrot.lane.b32.xlu1 %v1509_v16, %s1384_s18 }
 0x2c7   : > { %v721_v62 = vpop.xlane.xlu1 %720 }
 0x2c8   : > { %v722_v63 = vsub.f32 %v718_v40, %v721_v62 }
 0x2ca   : > { %v723_v0 = vmul.f32 1.442695, %v722_v63  ;;  %v1222_v63 = vld [vmem:[%s1608_s8] ss:$0 sm:$0xff] }
 0x2cc   : > { %1355 = vpow2.f32 %v723_v0  ;;  %v1085_v0 = vunpack.c.l.bf16 %v1495_v6 }
 0x2cf   : > { %v832_v2 = vpop.xlane.xlu0 %831 }
 0x2d0   : > { %v833_v3 = vsub.f32 %v829_v46, %v832_v2 }
 0x2d2   : > { %v834_v4 = vmul.f32 1.442695, %v833_v3 }
 0x2d4   : > { %1357 = vpow2.f32 %v834_v4 }
 0x2d6   : > { %v1356_v5 = vpop.eup %1355 }
 0x2d7   : > { %v943_v7 = vpop.xlane.xlu0 %942  ;;  %v725_v8 = vsel %vm556_vm2, %v1356_v5, 0.0 }
 0x2d8   : > { %v944_v9 = vsub.f32 %v940_v52, %v943_v7  ;;  %726 = vadd.xlane.f32.xlu0 %v725_v8 }
 0x2da   : > { %v945_v10 = vmul.f32 1.442695, %v944_v9 }
 0x2dc   : > { %1359 = vpow2.f32 %v945_v10 }
 0x2de   : > { %v1358_v11 = vpop.eup %1357 }
 0x2df   : > { %v836_v12 = vsel %vm556_vm2, %v1358_v11, 0.0 }
 0x2e0   : > { %837 = vadd.xlane.f32.xlu1 %v836_v12 }
 0x2e6   : > { %v1360_v13 = vpop.eup %1359 }
 0x2e7   : > { %v947_v14 = vsel %vm556_vm2, %v1360_v13, 0.0 }
 0x2e8   : > { %948 = vadd.xlane.f32.xlu0 %v947_v14 }
 0x2f1   : > { %842 = vrot.lane.b32.xlu1 %v1509_v16, %s1385_s29 }
 0x2f3   : > { %v613_v15 = vpop.xlane.xlu1 %612 }
 0x2f4   : > { %1361 = vrcp.f32 %v613_v15 }
 0x2f5   : > { %953 = vrot.lane.b32.xlu1 %v1509_v16, %s1386_s30  ;;  %s415_s30 = scalar_lea.vmem %s1611_s11, %s1482_s27 }
 0x2f7   : > { %v619_v17 = vpop.permute.xlu1 %618 }
 0x2f8   : > { %v625_v18 = vsel %vm623_vm4, %v619_v17, 0 }
 0x2f9   : > { %1278 = vmatpush3.bf16.msra.mxu1 %v625_v18 }
 0x2fa   : > { %1289 = vmatprep.subr.bf16.mxu1 %v1379_v1 }
 0x2fe   : > { %v1362_v19 = vpop.eup %1361  ;;  %731 = vrot.lane.b32.xlu0 %v1509_v16, %s1387_s12 }
 0x2ff   : > { %v615_v20 = vmul.f32 %v1362_v19, %v1354_v60  ;;  %v1226_v19 = vld [vmem:[%s1609_s9] ss:$0 sm:$0xff] }
 0x301   : > { %v616_v21 = vpack.c.bf16 %v615_v20, %v615_v20 }
 0x303   : > { %1280 = vmatmul.mubr.msk.bf16.vlgmr.msra.gmra.mrb[4].mxu1 %vm556_vm2, %v616_v21  ;;  %v1227_v21 = vld [vmem:[%s1610_s10] ss:$0 sm:$0xff] }
 0x304   : > { %1291 = vmatprep.mubr.msk.bf16.mxu1 %vm1380_vm0, %v1379_v1 }
 0x365   : > { %v727_v22 = vpop.xlane.xlu0 %726 }
 0x366   : > { %1363 = vrcp.f32 %v727_v22 }
 0x36d   : > { %v838_v23 = vpop.xlane.xlu1 %837 }
 0x36e   : > { %1365 = vrcp.f32 %v838_v23 }
 0x370   : > { %v1364_v24 = vpop.eup %1363 }
 0x371   : > { %v729_v26 = vmul.f32 %v1364_v24, %v1356_v5  ;;  %v843_v29 = vpop.permute.xlu1 %842 }
 0x372   : > { %v848_v31 = vsel %vm623_vm4, %v843_v29, 0 }
 0x373   : > { %v730_v16 = vpack.c.bf16 %v729_v26, %v729_v26 }
 0x375   : > { %v949_v25 = vpop.xlane.xlu0 %948  ;;  %v954_v33 = vpop.permute.xlu1 %953 }
 0x376   : > { %1367 = vrcp.f32 %v949_v25  ;;  %v959_v36 = vsel %vm623_vm4, %v954_v33, 0 }
 0x378   : > { %v1366_v30 = vpop.eup %1365 }
 0x379   : > { %v732_v27 = vpop.permute.xlu0 %731  ;;  %v840_v32 = vmul.f32 %v1366_v30, %v1358_v11 }
 0x37a   : > { %v737_v28 = vsel %vm623_vm4, %v732_v27, 0 }
 0x37b   : > { %1290 = vmatpush3.bf16.msra.mxu1 %v737_v28  ;;  %v841_v34 = vpack.c.bf16 %v840_v32, %v840_v32 }
 0x37c   : > { %1301 = vmatprep.subr.bf16.mxu1 %v1379_v1 }
 0x37e   : > { %1292 = vmatmul.mubr.msk.bf16.vlgmr.msra.gmra.mrb[8].mxu1 %vm556_vm2, %v730_v16 }
 0x37f   : > { %1302 = vmatpush3.bf16.msra.mxu1 %v848_v31  ;;  %1303 = vmatprep.mubr.msk.bf16.mxu1 %vm1380_vm0, %v1379_v1 }
 0x380   : > { %1313 = vmatprep.subr.bf16.mxu1 %v1379_v1  ;;  %v1368_v35 = vpop.eup %1367 }
 0x381   : > { %v951_v37 = vmul.f32 %v1368_v35, %v1360_v13 }
 0x383   : > { %v952_v38 = vpack.c.bf16 %v951_v37, %v951_v37 }
 0x386   : > { %1304 = vmatmul.mubr.msk.bf16.vlgmr.msra.gmra.mrb[12].mxu1 %vm556_vm2, %v841_v34 }
 0x387   : > { %1314 = vmatpush3.bf16.msra.mxu1 %v959_v36  ;;  %1315 = vmatprep.mubr.msk.bf16.mxu1 %vm1380_vm0, %v1379_v1 }
 0x38e   : > { %1316 = vmatmul.mubr.msk.bf16.vlgmr.msra.gmra.mrb[16].mxu1 %vm556_vm2, %v952_v38 }
 0x3d6   : > { %v661_v39 = vpop.f32.mrb[4].mxu1 }
 0x3d7   : > { %v1281_v40 = vpop.f32.mrb[5].mxu1 }
 0x3d8   : > { %v664_v41 = vpop.f32.mrb[6].mxu1 }
 0x3d9   : > { %v1282_v42 = vpop.f32.mrb[7].mxu1 }
 0x451   : > { %v773_v44 = vpop.f32.mrb[8].mxu1 }
 0x452   : > { %1002 = vrot.lane.b32.xlu0 %v773_v44, %s1388_s15  ;;  %v1293_v45 = vpop.f32.mrb[9].mxu1 }
 0x453   : > { %v776_v46 = vpop.f32.mrb[10].mxu1 }
 0x454   : > { %v1294_v47 = vpop.f32.mrb[11].mxu1 }
 0x459   : > { %v884_v49 = vpop.f32.mrb[12].mxu1 }
 0x45a   : > { %1006 = vrot.lane.b32.xlu1 %v884_v49, %s1389_s20  ;;  %v1305_v50 = vpop.f32.mrb[13].mxu1 }
 0x45b   : > { %v887_v51 = vpop.f32.mrb[14].mxu1 }
 0x45c   : > { %v1306_v52 = vpop.f32.mrb[15].mxu1 }
 0x461   : > { %v995_v53 = vpop.f32.mrb[16].mxu1 }
 0x462   : > { %1010 = vrot.lane.b32.xlu0 %v995_v53, %s1390_s21  ;;  %v1317_v1 = vpop.f32.mrb[17].mxu1 }
 0x463   : > { %v998_v54 = vpop.f32.mrb[18].mxu1 }
 0x464   : > { %v1318_v55 = vpop.f32.mrb[19].mxu1 }
 0x4c4   : > { %v1003_v56 = vpop.permute.xlu0 %1002 }
 0x4c5   : > { %v1013_v58 = vsel %vm556_vm2, %v661_v39, %v1003_v56 }
 0x4cc   : > { %v1007_v57 = vpop.permute.xlu1 %1006 }
 0x4cd   : > { %v1015_v59 = vsel %vm1014_vm5, %v1013_v58, %v1007_v57 }
 0x4d4   : > { %v1011_v60 = vpop.permute.xlu0 %1010 }
 0x4d5   : > { %v1017_v61 = vsel %vm1016_vm6, %v1015_v59, %v1011_v60 }
 0x4d6   : > { %v1018_v62 = vpack.c.bf16 %v1017_v61, %v1017_v61 }
 0x4d8   : > { %1324 = vmatmul.mubr.msk.bf16.vlgmr.msra.gmra.mrb[20].mxu0 %vm443_vm1, %v1018_v62 }
 0x5ab   : > { %v1079_v2 = vpop.f32.mrb[20].mxu0 }
 0x5ac   : > { %v1080_v3 = vadd.f32 %v1222_v63, %v1079_v2  ;;  %v1325_v4 = vpop.f32.mrb[21].mxu0 }
 0x5ad   : > { %v1082_v5 = vpop.f32.mrb[22].mxu0 }
 0x5ae   : > { %v1326_v7 = vpop.f32.mrb[23].mxu0  ;;  %v1086_v8 = vadd.f32 %v1085_v0, %v1080_v3 }
 0x5b0   : > { %v1087_v9 = vsel %vm443_vm1, %v1086_v8, 0.0 }
 0x5b1   : > { %1088 = vadd.xlane.f32.xlu1 %v1087_v9 }
 0x63e   : > { %v1089_v10 = vpop.xlane.xlu1 %1088 }
 0x63f   : > { %v1091_v11 = vmul.f32 0.03125, %v1089_v10 }
 0x641   : > { %v1092_v12 = vsub.f32 %v1086_v8, %v1091_v11 }
 0x643   : > { %v1093_v13 = vmul.f32 %v1092_v12, %v1092_v12 }
 0x645   : > { %v1094_v14 = vsel %vm443_vm1, %v1093_v13, 0.0 }
 0x646   : > { %1095 = vadd.xlane.f32.xlu0 %v1094_v14 }
 0x6d3   : > { %v1096_v15 = vpop.xlane.xlu0 %1095 }
 0x6d4   : > { %v1097_v17 = vmul.f32 0.03125, %v1096_v15 }
 0x6d6   : > { %v1098_v6 = vadd.f32 1e-05, %v1097_v17 }
 0x6d8   : > { %1369 = vrsqrt.f32 %v1098_v6 }
 0x6e2   : > { %v1370_v18 = vpop.eup %1369 }
 0x6e3   : > { %v1100_v20 = vmul.f32 %v1370_v18, %v1092_v12 }
 0x6e5   : > { %v1108_v22 = vmul.f32 %v1226_v19, %v1100_v20 }
 0x6e7   : > { %v1116_v23 = vadd.f32 %v1227_v21, %v1108_v22 }
 0x6e9   : > { %v1117_v24 = vpack.c.bf16 %v1116_v23, %v1116_v23 }
 0x6eb   : > { %1119 = vst.msk [vmem:[%s415_s30] sm:$0xf] %vm1118_vm7, %v1117_v24 }
 0x6ec PF: > { %s21_s17 = sadd.s32 1, %s1377_s17  }
 0x6ed   : > { %p18_p4 = scmp.ge.s32.totalorder %s21_s17, 4  }
 0x6ef   :  { %20 = sbr.rel (!%p18_p4) target bundleno = 1 (0x1), region = 100 }

</bundles_post_ra>
